<compile_context>
chip_gen: v5e
topology: v5e:2x2
jax: 0.10.0
libtpu: 0.0.40
codegen_flags: <defaults>
</compile_context>

<pallas_src>
import functools

import jax
import jax.numpy as jnp
from jax.experimental import pallas as pl
from jax.experimental.pallas import tpu as pltpu


# --------------------------------------------------------------------------
# Fused Pallas kernel: whole TCN stack, batch folded into the lane axis.
# --------------------------------------------------------------------------
def _tcn_stack_kernel(kernel_size, dilations, C, T, B, matmul_dtype, *refs):
    # refs = (alphas_smem, x_slab, weight_slab_0..weight_slab_{nb-1}, out)
    alphas_ref = refs[0]
    x_ref = refs[1]
    o_ref = refs[-1]
    slab_refs = refs[2:-1]

    k = kernel_size
    BT = B * T

    if matmul_dtype == jnp.float32:
        cast = lambda a: a
    else:
        cast = lambda a: a.astype(matmul_dtype)

    # Within-batch time position, used to zero the 'same'-padding halo of each
    # dilated tap (makes the full-width lane roll per-batch correct).
    tpos = jax.lax.broadcasted_iota(jnp.int32, (1, BT), 1) % T

    x = x_ref[...].astype(jnp.float32)                  # (Cg0, B*T)

    def gln(y, gamma, beta, cg):
        """Per-batch GlobalLayerNorm: two-pass (robust), unbiased (N-1),
        applied as d*scale + beta (scale folded with gamma, rsqrt on EUP)."""
        n = float(cg * T)
        pieces = []
        for b in range(B):
            yb = y[:, b * T:(b + 1) * T]                # 128-aligned lane slice
            mean = jnp.sum(yb) / n
            d = yb - mean
            var = jnp.sum(d * d) / (n - 1.0)
            scale = gamma * jax.lax.rsqrt(var)          # (cg, 1)
            pieces.append(d * scale + beta)
        return jnp.concatenate(pieces, axis=1)          # (cg, B*T)

    for i, dil in enumerate(dilations):
        slab = slab_refs[i]                             # (cg, (k+2)*cg + 8)
        cg = slab.shape[0]

        a1 = alphas_ref[2 * i]                          # SMEM scalar PReLU alphas
        a2 = alphas_ref[2 * i + 1]

        # --- static slices of the packed per-block weight slab -------------
        w1 = slab[:, 0:cg]                              # (cg, cg)
        wdpc = slab[:, cg:(k + 1) * cg]                 # (cg, k*cg) fused taps
        w3 = slab[0:C, (k + 1) * cg:(k + 2) * cg]       # (C, cg)
        v = slab[:, (k + 2) * cg:(k + 2) * cg + 8]      # (cg, 8) packed vectors
        b1, g1, bt1 = v[:, 0:1], v[:, 1:2], v[:, 2:3]
        bdp, g2, bt2 = v[:, 3:4], v[:, 4:5], v[:, 5:6]
        b3 = v[:C, 6:7]

        res = x[:C, :]                                  # residual (C, B*T)

        # ---- 1x1 Conv1d -> PReLU -> GlobalLayerNorm -----------------------
        y = jnp.dot(cast(w1), cast(x),
                    preferred_element_type=jnp.float32) + b1
        y = jnp.where(y >= 0, y, a1 * y)
        y = gln(y, g1, bt1, cg)

        # ---- dilated depthwise ('same') folded into the pointwise 1x1 -----
        # All k taps fused into a single K-concatenated MXU push:
        #   out = [W0|W1|W2] @ [shift_0(y); shift_1(y); shift_2(y)] + bias
        pad_left = (dil * (k - 1)) // 2
        taps = []
        for j in range(k):
            s = j * dil - pad_left                      # static shift per tap
            if s == 0:
                taps.append(y)
            else:
                zr = pltpu.roll(y, (-s) % BT, 1)        # XLU lane rotation
                mask = (tpos < (T - s)) if s > 0 else (tpos >= (-s))
                taps.append(jnp.where(mask, zr, 0.0))
        Z = jnp.concatenate(taps, axis=0)               # (k*cg, B*T)
        y = jnp.dot(cast(wdpc), cast(Z),
                    preferred_element_type=jnp.float32) + bdp

        # ---- PReLU -> GlobalLayerNorm -> final 1x1 conv + residual --------
        y = jnp.where(y >= 0, y, a2 * y)
        y = gln(y, g2, bt2, cg)
        out = jnp.dot(cast(w3), cast(y),
                      preferred_element_type=jnp.float32) + b3
        x = res + out                                   # (C, B*T): next input

    o_ref[...] = x.astype(o_ref.dtype)


def tcn_net(x, embeddings, all_params, kernel_size, dilations,
            matmul_dtype=jnp.float32):
    """Fused forward of the TCN stack (block 0 receives the speaker embedding)."""
    B, C, T = x.shape
    if embeddings is not None:
        emb = jnp.broadcast_to(embeddings[:, :, None],
                               (B, embeddings.shape[1], T))
        x_cat = jnp.concatenate([x, emb], axis=1)
    else:
        x_cat = x
    Cg0 = x_cat.shape[1]
    BT = B * T
    nb = len(all_params)
    k = kernel_size

    # Fold batch into the lane / matmul-N axis: (Cg0, B*T).
    x_slab = jnp.transpose(x_cat, (1, 0, 2)).reshape(Cg0, BT)

    # ---- host-side parameter packing (cheap, once per call) --------------
    # Flat 1-D SMEM array of PReLU alphas: [a1_0, a2_0, a1_1, a2_1, ...]
    alphas = jnp.stack([p[key][0, 0]
                        for p in all_params for key in ('a1', 'a2')])

    slabs = []
    for p in all_params:
        cg = p['w1'].shape[0]
        # Depthwise folded into pointwise: tap j weight Wj[o,c] = wpw[o,c]*wdw[c,j]
        wdp_cat = jnp.concatenate(
            [p['wpw'] * p['wdw'][:, j][None, :] for j in range(k)], axis=1)
        bias_dp = p['wpw'] @ p['bdw'] + p['bpw']                  # wpw@bdw + bpw
        w3_blk = jnp.zeros((cg, cg), jnp.float32).at[:C, :].set(p['w3'])
        b3pad = jnp.zeros((cg, 1), jnp.float32).at[:C].set(p['b3'])
        vecs = jnp.concatenate(
            [p['b1'], p['g1'], p['bt1'], bias_dp, p['g2'], p['bt2'], b3pad,
             jnp.zeros((cg, 1), jnp.float32)], axis=1)            # (cg, 8)
        # One lane-dense weight slab per block: [w1 | taps | w3 | vecs].
        slabs.append(jnp.concatenate([p['w1'], wdp_cat, w3_blk, vecs],
                                     axis=1).astype(jnp.float32))

    in_specs = ([pl.BlockSpec(memory_space=pltpu.MemorySpace.SMEM)]
                + [pl.BlockSpec(memory_space=pltpu.MemorySpace.VMEM)] * (1 + nb))

    # Advisory cost estimate so XLA can overlap neighbours around this kernel.
    flops = 0
    for p in all_params:
        cg = p['w1'].shape[0]
        flops += 2 * BT * (cg * cg + cg * k * cg + C * cg)   # matmuls
        flops += 30 * BT * cg                                # elementwise (approx)
    bytes_accessed = 4 * (Cg0 * BT + C * BT + sum(int(s.size) for s in slabs)
                          + int(alphas.size))
    cost = pl.CostEstimate(flops=int(flops), transcendentals=2 * nb * B,
                           bytes_accessed=int(bytes_accessed))

    kern = functools.partial(_tcn_stack_kernel, kernel_size, tuple(dilations),
                             C, T, B, matmul_dtype)
    out_slab = pl.pallas_call(
        kern,
        out_shape=jax.ShapeDtypeStruct((C, BT), x.dtype),
        in_specs=in_specs,
        out_specs=pl.BlockSpec(memory_space=pltpu.MemorySpace.VMEM),
        cost_estimate=cost,
    )(alphas, x_slab, *slabs)

    return out_slab.reshape(C, B, T).transpose(1, 0, 2)


# --------------------------------------------------------------------------
# Deterministic parameter init (shapes follow the PyTorch module)
# --------------------------------------------------------------------------
def init_block_params(key, C, Cg, kernel_size):
    ks = jax.random.split(key, 12)
    dt = jnp.float32

    def u(k, shape, scale):
        return jax.random.uniform(k, shape, dt, -scale, scale)

    s_pw = Cg ** -0.5
    s_dw = kernel_size ** -0.5
    p = {
        'w1':  u(ks[0], (Cg, Cg), s_pw),          # Conv1d(Cg, Cg, 1)
        'b1':  u(ks[1], (Cg, 1), s_pw),
        'a1':  jnp.full((1, 1), 0.25, dt),        # PReLU default (1 shared alpha)
        'g1':  1.0 + 0.1 * jax.random.normal(ks[2], (Cg, 1), dt),   # Linear(1,Cg).weight
        'bt1': 0.1 * jax.random.normal(ks[3], (Cg, 1), dt),         # Linear(1,Cg).bias
        'wdw': u(ks[4], (Cg, kernel_size), s_dw), # depthwise Conv1d weight (Cg,1,k)
        'bdw': u(ks[5], (Cg, 1), s_dw),
        'wpw': u(ks[6], (Cg, Cg), s_pw),          # pointwise Conv1d(Cg,Cg,1)
        'bpw': u(ks[7], (Cg, 1), s_pw),
        'a2':  jnp.full((1, 1), 0.25, dt),
        'g2':  1.0 + 0.1 * jax.random.normal(ks[8], (Cg, 1), dt),
        'bt2': 0.1 * jax.random.normal(ks[9], (Cg, 1), dt),
        'w3':  u(ks[10], (C, Cg), s_pw),          # Conv1d(Cg, C, 1)
        'b3':  u(ks[11], (C, 1), s_pw),
    }
    return p


# --------------------------------------------------------------------------
# Pure-JAX reference (mirror of the PyTorch forward) for a correctness check
# --------------------------------------------------------------------------
def _gln_ref(x, gamma, beta):
    n = x.shape[1] * x.shape[2]
    mean = jnp.mean(x, axis=(1, 2), keepdims=True)
    d = x - mean
    var = jnp.sum(d * d, axis=(1, 2), keepdims=True) / (n - 1)
    return d / jnp.sqrt(var) * gamma.reshape(1, -1, 1) + beta.reshape(1, -1, 1)


def _tcn_block_ref(x_cat, x_init, p, kernel_size, dilation):
    hp = jax.lax.Precision.HIGHEST
    y = jnp.einsum('oc,bct->bot', p['w1'], x_cat, precision=hp) + p['b1'].reshape(1, -1, 1)
    y = jnp.where(y >= 0, y, p['a1'][0, 0] * y)
    y = _gln_ref(y, p['g1'][:, 0], p['bt1'][:, 0])
    T = x_cat.shape[-1]
    pad_total = dilation * (kernel_size - 1)
    pad_left = pad_total // 2
    yp = jnp.pad(y, ((0, 0), (0, 0), (pad_left, pad_total - pad_left)))
    acc = jnp.zeros_like(y)
    for j in range(kernel_size):
        acc = acc + p['wdw'][:, j].reshape(1, -1, 1) * yp[:, :, j * dilation:j * dilation + T]
    y = acc + p['bdw'].reshape(1, -1, 1)
    y = jnp.einsum('oc,bct->bot', p['wpw'], y, precision=hp) + p['bpw'].reshape(1, -1, 1)
    y = jnp.where(y >= 0, y, p['a2'][0, 0] * y)
    y = _gln_ref(y, p['g2'][:, 0], p['bt2'][:, 0])
    y = jnp.einsum('oc,bct->bot', p['w3'], y, precision=hp) + p['b3'].reshape(1, -1, 1)
    return x_init + y


def tcn_net_ref(x, embeddings, all_params, kernel_size, dilations):
    B, C, T = x.shape
    for i, (p, d) in enumerate(zip(all_params, dilations)):
        x_init = x
        if i == 0 and embeddings is not None:
            emb = jnp.broadcast_to(embeddings[:, :, None],
                                   (B, embeddings.shape[1], T))
            x_cat = jnp.concatenate([x, emb], axis=1)
        else:
            x_cat = x
        x = _tcn_block_ref(x_cat, x_init, p, kernel_size, d)
    return x


# --------------------------------------------------------------------------
if __name__ == "__main__":
    key = jax.random.PRNGKey(0)
    B, C, C_embed, T = 2, 16, 16, 128
    kernel_size = 3
    dilations = (1, 2, 4)

    k_x, k_e, k_p = jax.random.split(key, 3)
    x = jax.random.normal(k_x, (B, C, T), jnp.float32)
    embeddings = jax.random.normal(k_e, (B, C_embed), jnp.float32)

    block_keys = jax.random.split(k_p, len(dilations))
    all_params = []
    for i, _ in enumerate(dilations):
        Cg = C + C_embed * (i == 0)
        all_params.append(init_block_params(block_keys[i], C, Cg, kernel_size))

    # f32 matmul operands for the strict correctness check; pass
    # matmul_dtype=jnp.bfloat16 for the production throughput lever (v5e).
    out = tcn_net(x, embeddings, all_params, kernel_size, dilations,
                  matmul_dtype=jnp.float32)
    out = jax.block_until_ready(out)

    ref = jax.block_until_ready(
        tcn_net_ref(x, embeddings, all_params, kernel_size, dilations))

    assert out.shape == (B, C, T)
    max_err = float(jnp.max(jnp.abs(out - ref)))
    assert max_err < 2e-2, f"max abs error vs reference: {max_err}"
    print("KERNEL_OK")
</pallas_src>

<mosaic_0001>
module attributes {stable_mosaic.version = 11 : i64} {
  func.func @_tcn_stack_kernel(%arg0: memref<6xf32, #tpu.memory_space<smem>>, %arg1: memref<32x256xf32, #tpu.memory_space<vmem>>, %arg2: memref<32x168xf32, #tpu.memory_space<vmem>>, %arg3: memref<16x88xf32, #tpu.memory_space<vmem>>, %arg4: memref<16x88xf32, #tpu.memory_space<vmem>>, %arg5: memref<16x256xf32, #tpu.memory_space<vmem>>) attributes {dimension_semantics = [], scalar_prefetch = 0 : i64, scratch_operands = 0 : i64, tpu.core_type = #tpu.core_type<tc>} {
    %0 = tpu.iota {dimensions = array<i32: 1>} : vector<1x256xi32>
    %c128_i32 = arith.constant 128 : i32
    %c0_i32 = arith.constant 0 : i32
    %1 = arith.cmpi eq, %c128_i32, %c0_i32 : i32
    %c1_i32 = arith.constant 1 : i32
    %2 = arith.select %1, %c1_i32, %c128_i32 : i32
    %3 = vector.broadcast %2 : i32 to vector<1x256xi32>
    %4 = arith.remsi %0, %3 : vector<1x256xi32>
    %c0_i32_0 = arith.constant 0 : i32
    %5 = vector.broadcast %c0_i32_0 : i32 to vector<1x256xi32>
    %6 = arith.cmpi ne, %4, %5 : vector<1x256xi32>
    %c0_i32_1 = arith.constant 0 : i32
    %7 = vector.broadcast %c0_i32_1 : i32 to vector<1x256xi32>
    %8 = arith.cmpi slt, %4, %7 : vector<1x256xi32>
    %c0_i32_2 = arith.constant 0 : i32
    %9 = arith.cmpi slt, %2, %c0_i32_2 : i32
    %10 = vector.broadcast %9 : i1 to vector<1x256xi1>
    %11 = vector.broadcast %10 : vector<1x256xi1> to vector<1x256xi1>
    %12 = arith.xori %8, %11 : vector<1x256xi1>
    %13 = arith.andi %12, %6 : vector<1x256xi1>
    %14 = vector.broadcast %2 : i32 to vector<1x256xi32>
    %15 = arith.addi %4, %14 : vector<1x256xi32>
    %16 = arith.select %13, %15, %4 : vector<1x256xi1>, vector<1x256xi32>
    %c0 = arith.constant 0 : index
    %c0_3 = arith.constant 0 : index
    %17 = vector.load %arg1[%c0, %c0_3] : memref<32x256xf32, #tpu.memory_space<vmem>>, vector<32x256xf32>
    %c0_4 = arith.constant 0 : index
    %18 = memref.load %arg0[%c0_4] : memref<6xf32, #tpu.memory_space<smem>>
    %c1 = arith.constant 1 : index
    %19 = memref.load %arg0[%c1] : memref<6xf32, #tpu.memory_space<smem>>
    %c0_5 = arith.constant 0 : index
    %c0_6 = arith.constant 0 : index
    %20 = vector.load %arg2[%c0_5, %c0_6] : memref<32x168xf32, #tpu.memory_space<vmem>>, vector<32x32xf32>
    %c0_7 = arith.constant 0 : index
    %c32 = arith.constant 32 : index
    %21 = vector.load %arg2[%c0_7, %c32] : memref<32x168xf32, #tpu.memory_space<vmem>>, vector<32x96xf32>
    %c0_8 = arith.constant 0 : index
    %c128 = arith.constant 128 : index
    %22 = vector.load %arg2[%c0_8, %c128] : memref<32x168xf32, #tpu.memory_space<vmem>>, vector<16x32xf32>
    %c0_9 = arith.constant 0 : index
    %c160 = arith.constant 160 : index
    %23 = vector.load %arg2[%c0_9, %c160] : memref<32x168xf32, #tpu.memory_space<vmem>>, vector<32x8xf32>
    %24 = vector.extract_strided_slice %23 {offsets = [0, 0], sizes = [32, 1], strides = [1, 1]} : vector<32x8xf32> to vector<32x1xf32>
    %25 = vector.extract_strided_slice %23 {offsets = [0, 1], sizes = [32, 1], strides = [1, 1]} : vector<32x8xf32> to vector<32x1xf32>
    %26 = vector.extract_strided_slice %23 {offsets = [0, 2], sizes = [32, 1], strides = [1, 1]} : vector<32x8xf32> to vector<32x1xf32>
    %27 = vector.extract_strided_slice %23 {offsets = [0, 3], sizes = [32, 1], strides = [1, 1]} : vector<32x8xf32> to vector<32x1xf32>
    %28 = vector.extract_strided_slice %23 {offsets = [0, 4], sizes = [32, 1], strides = [1, 1]} : vector<32x8xf32> to vector<32x1xf32>
    %29 = vector.extract_strided_slice %23 {offsets = [0, 5], sizes = [32, 1], strides = [1, 1]} : vector<32x8xf32> to vector<32x1xf32>
    %30 = vector.extract_strided_slice %23 {offsets = [0, 6], sizes = [16, 1], strides = [1, 1]} : vector<32x8xf32> to vector<16x1xf32>
    %31 = vector.extract_strided_slice %17 {offsets = [0, 0], sizes = [16, 256], strides = [1, 1]} : vector<32x256xf32> to vector<16x256xf32>
    %cst = arith.constant dense<0.000000e+00> : vector<32x256xf32>
    %32 = tpu.matmul %20, %17, %cst {dimension_numbers = #tpu.dot_dimension_numbers<[1], [0], [0], [1], [0, 0, 1, 1], [], []>} : vector<32x32xf32>, vector<32x256xf32>, vector<32x256xf32> -> vector<32x256xf32>
    %33 = vector.broadcast %24 : vector<32x1xf32> to vector<32x256xf32>
    %34 = arith.addf %32, %33 : vector<32x256xf32>
    %cst_10 = arith.constant 0.000000e+00 : f32
    %35 = vector.broadcast %cst_10 : f32 to vector<32x256xf32>
    %36 = arith.cmpf oge, %34, %35 : vector<32x256xf32>
    %37 = vector.broadcast %18 : f32 to vector<32x256xf32>
    %38 = arith.mulf %37, %34 : vector<32x256xf32>
    %39 = arith.select %36, %34, %38 : vector<32x256xi1>, vector<32x256xf32>
    %40 = vector.extract_strided_slice %39 {offsets = [0, 0], sizes = [32, 128], strides = [1, 1]} : vector<32x256xf32> to vector<32x128xf32>
    %41 = vector.shape_cast %40 : vector<32x128xf32> to vector<1x32x128xf32>
    %cst_11 = arith.constant dense<0.000000e+00> : vector<1xf32>
    %42 = vector.multi_reduction <add>, %41, %cst_11 [1, 2] : vector<1x32x128xf32> to vector<1xf32>
    %43 = vector.shape_cast %42 : vector<1xf32> to vector<1x1x1xf32>
    %44 = vector.extract %43[0, 0, 0] : f32 from vector<1x1x1xf32>
    %cst_12 = arith.constant 4.096000e+03 : f32
    %45 = arith.divf %44, %cst_12 : f32
    %46 = vector.broadcast %45 : f32 to vector<32x128xf32>
    %47 = arith.subf %40, %46 : vector<32x128xf32>
    %48 = arith.mulf %47, %47 : vector<32x128xf32>
    %49 = vector.shape_cast %48 : vector<32x128xf32> to vector<1x32x128xf32>
    %cst_13 = arith.constant dense<0.000000e+00> : vector<1xf32>
    %50 = vector.multi_reduction <add>, %49, %cst_13 [1, 2] : vector<1x32x128xf32> to vector<1xf32>
    %51 = vector.shape_cast %50 : vector<1xf32> to vector<1x1x1xf32>
    %52 = vector.extract %51[0, 0, 0] : f32 from vector<1x1x1xf32>
    %cst_14 = arith.constant 4.095000e+03 : f32
    %53 = arith.divf %52, %cst_14 : f32
    %54 = math.rsqrt %53 : f32
    %55 = vector.broadcast %54 : f32 to vector<32x1xf32>
    %56 = arith.mulf %25, %55 : vector<32x1xf32>
    %57 = vector.broadcast %56 : vector<32x1xf32> to vector<32x128xf32>
    %58 = arith.mulf %47, %57 : vector<32x128xf32>
    %59 = vector.broadcast %26 : vector<32x1xf32> to vector<32x128xf32>
    %60 = arith.addf %58, %59 : vector<32x128xf32>
    %61 = vector.extract_strided_slice %39 {offsets = [0, 128], sizes = [32, 128], strides = [1, 1]} : vector<32x256xf32> to vector<32x128xf32>
    %62 = vector.shape_cast %61 : vector<32x128xf32> to vector<1x32x128xf32>
    %cst_15 = arith.constant dense<0.000000e+00> : vector<1xf32>
    %63 = vector.multi_reduction <add>, %62, %cst_15 [1, 2] : vector<1x32x128xf32> to vector<1xf32>
    %64 = vector.shape_cast %63 : vector<1xf32> to vector<1x1x1xf32>
    %65 = vector.extract %64[0, 0, 0] : f32 from vector<1x1x1xf32>
    %cst_16 = arith.constant 4.096000e+03 : f32
    %66 = arith.divf %65, %cst_16 : f32
    %67 = vector.broadcast %66 : f32 to vector<32x128xf32>
    %68 = arith.subf %61, %67 : vector<32x128xf32>
    %69 = arith.mulf %68, %68 : vector<32x128xf32>
    %70 = vector.shape_cast %69 : vector<32x128xf32> to vector<1x32x128xf32>
    %cst_17 = arith.constant dense<0.000000e+00> : vector<1xf32>
    %71 = vector.multi_reduction <add>, %70, %cst_17 [1, 2] : vector<1x32x128xf32> to vector<1xf32>
    %72 = vector.shape_cast %71 : vector<1xf32> to vector<1x1x1xf32>
    %73 = vector.extract %72[0, 0, 0] : f32 from vector<1x1x1xf32>
    %cst_18 = arith.constant 4.095000e+03 : f32
    %74 = arith.divf %73, %cst_18 : f32
    %75 = math.rsqrt %74 : f32
    %76 = vector.broadcast %75 : f32 to vector<32x1xf32>
    %77 = arith.mulf %25, %76 : vector<32x1xf32>
    %78 = vector.broadcast %77 : vector<32x1xf32> to vector<32x128xf32>
    %79 = arith.mulf %68, %78 : vector<32x128xf32>
    %80 = vector.broadcast %26 : vector<32x1xf32> to vector<32x128xf32>
    %81 = arith.addf %79, %80 : vector<32x128xf32>
    %82 = tpu.concatenate %60, %81 in 1 : vector<32x128xf32>, vector<32x128xf32> -> vector<32x256xf32>
    %c1_i32_19 = arith.constant 1 : i32
    %83 = tpu.dynamic_rotate %82 by %c1_i32_19 dim 1 : vector<32x256xf32>, i32 -> vector<32x256xf32>
    %c1_i32_20 = arith.constant 1 : i32
    %84 = vector.broadcast %c1_i32_20 : i32 to vector<1x256xi32>
    %85 = arith.cmpi sge, %16, %84 : vector<1x256xi32>
    %cst_21 = arith.constant 0.000000e+00 : f32
    %86 = vector.shape_cast %85 : vector<1x256xi1> to vector<1x256xi1>
    %87 = vector.broadcast %86 : vector<1x256xi1> to vector<32x256xi1>
    %88 = vector.broadcast %cst_21 : f32 to vector<32x256xf32>
    %89 = arith.select %87, %83, %88 : vector<32x256xi1>, vector<32x256xf32>
    %c255_i32 = arith.constant 255 : i32
    %90 = tpu.dynamic_rotate %82 by %c255_i32 dim 1 : vector<32x256xf32>, i32 -> vector<32x256xf32>
    %c127_i32 = arith.constant 127 : i32
    %91 = vector.broadcast %c127_i32 : i32 to vector<1x256xi32>
    %92 = arith.cmpi slt, %16, %91 : vector<1x256xi32>
    %cst_22 = arith.constant 0.000000e+00 : f32
    %93 = vector.shape_cast %92 : vector<1x256xi1> to vector<1x256xi1>
    %94 = vector.broadcast %93 : vector<1x256xi1> to vector<32x256xi1>
    %95 = vector.broadcast %cst_22 : f32 to vector<32x256xf32>
    %96 = arith.select %94, %90, %95 : vector<32x256xi1>, vector<32x256xf32>
    %97 = tpu.concatenate %89, %82, %96 in 0 : vector<32x256xf32>, vector<32x256xf32>, vector<32x256xf32> -> vector<96x256xf32>
    %cst_23 = arith.constant dense<0.000000e+00> : vector<32x256xf32>
    %98 = tpu.matmul %21, %97, %cst_23 {dimension_numbers = #tpu.dot_dimension_numbers<[1], [0], [0], [1], [0, 0, 1, 1], [], []>} : vector<32x96xf32>, vector<96x256xf32>, vector<32x256xf32> -> vector<32x256xf32>
    %99 = vector.broadcast %27 : vector<32x1xf32> to vector<32x256xf32>
    %100 = arith.addf %98, %99 : vector<32x256xf32>
    %cst_24 = arith.constant 0.000000e+00 : f32
    %101 = vector.broadcast %cst_24 : f32 to vector<32x256xf32>
    %102 = arith.cmpf oge, %100, %101 : vector<32x256xf32>
    %103 = vector.broadcast %19 : f32 to vector<32x256xf32>
    %104 = arith.mulf %103, %100 : vector<32x256xf32>
    %105 = arith.select %102, %100, %104 : vector<32x256xi1>, vector<32x256xf32>
    %106 = vector.extract_strided_slice %105 {offsets = [0, 0], sizes = [32, 128], strides = [1, 1]} : vector<32x256xf32> to vector<32x128xf32>
    %107 = vector.shape_cast %106 : vector<32x128xf32> to vector<1x32x128xf32>
    %cst_25 = arith.constant dense<0.000000e+00> : vector<1xf32>
    %108 = vector.multi_reduction <add>, %107, %cst_25 [1, 2] : vector<1x32x128xf32> to vector<1xf32>
    %109 = vector.shape_cast %108 : vector<1xf32> to vector<1x1x1xf32>
    %110 = vector.extract %109[0, 0, 0] : f32 from vector<1x1x1xf32>
    %cst_26 = arith.constant 4.096000e+03 : f32
    %111 = arith.divf %110, %cst_26 : f32
    %112 = vector.broadcast %111 : f32 to vector<32x128xf32>
    %113 = arith.subf %106, %112 : vector<32x128xf32>
    %114 = arith.mulf %113, %113 : vector<32x128xf32>
    %115 = vector.shape_cast %114 : vector<32x128xf32> to vector<1x32x128xf32>
    %cst_27 = arith.constant dense<0.000000e+00> : vector<1xf32>
    %116 = vector.multi_reduction <add>, %115, %cst_27 [1, 2] : vector<1x32x128xf32> to vector<1xf32>
    %117 = vector.shape_cast %116 : vector<1xf32> to vector<1x1x1xf32>
    %118 = vector.extract %117[0, 0, 0] : f32 from vector<1x1x1xf32>
    %cst_28 = arith.constant 4.095000e+03 : f32
    %119 = arith.divf %118, %cst_28 : f32
    %120 = math.rsqrt %119 : f32
    %121 = vector.broadcast %120 : f32 to vector<32x1xf32>
    %122 = arith.mulf %28, %121 : vector<32x1xf32>
    %123 = vector.broadcast %122 : vector<32x1xf32> to vector<32x128xf32>
    %124 = arith.mulf %113, %123 : vector<32x128xf32>
    %125 = vector.broadcast %29 : vector<32x1xf32> to vector<32x128xf32>
    %126 = arith.addf %124, %125 : vector<32x128xf32>
    %127 = vector.extract_strided_slice %105 {offsets = [0, 128], sizes = [32, 128], strides = [1, 1]} : vector<32x256xf32> to vector<32x128xf32>
    %128 = vector.shape_cast %127 : vector<32x128xf32> to vector<1x32x128xf32>
    %cst_29 = arith.constant dense<0.000000e+00> : vector<1xf32>
    %129 = vector.multi_reduction <add>, %128, %cst_29 [1, 2] : vector<1x32x128xf32> to vector<1xf32>
    %130 = vector.shape_cast %129 : vector<1xf32> to vector<1x1x1xf32>
    %131 = vector.extract %130[0, 0, 0] : f32 from vector<1x1x1xf32>
    %cst_30 = arith.constant 4.096000e+03 : f32
    %132 = arith.divf %131, %cst_30 : f32
    %133 = vector.broadcast %132 : f32 to vector<32x128xf32>
    %134 = arith.subf %127, %133 : vector<32x128xf32>
    %135 = arith.mulf %134, %134 : vector<32x128xf32>
    %136 = vector.shape_cast %135 : vector<32x128xf32> to vector<1x32x128xf32>
    %cst_31 = arith.constant dense<0.000000e+00> : vector<1xf32>
    %137 = vector.multi_reduction <add>, %136, %cst_31 [1, 2] : vector<1x32x128xf32> to vector<1xf32>
    %138 = vector.shape_cast %137 : vector<1xf32> to vector<1x1x1xf32>
    %139 = vector.extract %138[0, 0, 0] : f32 from vector<1x1x1xf32>
    %cst_32 = arith.constant 4.095000e+03 : f32
    %140 = arith.divf %139, %cst_32 : f32
    %141 = math.rsqrt %140 : f32
    %142 = vector.broadcast %141 : f32 to vector<32x1xf32>
    %143 = arith.mulf %28, %142 : vector<32x1xf32>
    %144 = vector.broadcast %143 : vector<32x1xf32> to vector<32x128xf32>
    %145 = arith.mulf %134, %144 : vector<32x128xf32>
    %146 = vector.broadcast %29 : vector<32x1xf32> to vector<32x128xf32>
    %147 = arith.addf %145, %146 : vector<32x128xf32>
    %148 = tpu.concatenate %126, %147 in 1 : vector<32x128xf32>, vector<32x128xf32> -> vector<32x256xf32>
    %cst_33 = arith.constant dense<0.000000e+00> : vector<16x256xf32>
    %149 = tpu.matmul %22, %148, %cst_33 {dimension_numbers = #tpu.dot_dimension_numbers<[1], [0], [0], [1], [0, 0, 1, 1], [], []>} : vector<16x32xf32>, vector<32x256xf32>, vector<16x256xf32> -> vector<16x256xf32>
    %150 = vector.broadcast %30 : vector<16x1xf32> to vector<16x256xf32>
    %151 = arith.addf %149, %150 : vector<16x256xf32>
    %152 = arith.addf %31, %151 : vector<16x256xf32>
    %c2 = arith.constant 2 : index
    %153 = memref.load %arg0[%c2] : memref<6xf32, #tpu.memory_space<smem>>
    %c3 = arith.constant 3 : index
    %154 = memref.load %arg0[%c3] : memref<6xf32, #tpu.memory_space<smem>>
    %c0_34 = arith.constant 0 : index
    %c0_35 = arith.constant 0 : index
    %155 = vector.load %arg3[%c0_34, %c0_35] : memref<16x88xf32, #tpu.memory_space<vmem>>, vector<16x16xf32>
    %c0_36 = arith.constant 0 : index
    %c16 = arith.constant 16 : index
    %156 = vector.load %arg3[%c0_36, %c16] : memref<16x88xf32, #tpu.memory_space<vmem>>, vector<16x48xf32>
    %c0_37 = arith.constant 0 : index
    %c64 = arith.constant 64 : index
    %157 = vector.load %arg3[%c0_37, %c64] : memref<16x88xf32, #tpu.memory_space<vmem>>, vector<16x16xf32>
    %c0_38 = arith.constant 0 : index
    %c80 = arith.constant 80 : index
    %158 = vector.load %arg3[%c0_38, %c80] : memref<16x88xf32, #tpu.memory_space<vmem>>, vector<16x8xf32>
    %159 = vector.extract_strided_slice %158 {offsets = [0, 0], sizes = [16, 1], strides = [1, 1]} : vector<16x8xf32> to vector<16x1xf32>
    %160 = vector.extract_strided_slice %158 {offsets = [0, 1], sizes = [16, 1], strides = [1, 1]} : vector<16x8xf32> to vector<16x1xf32>
    %161 = vector.extract_strided_slice %158 {offsets = [0, 2], sizes = [16, 1], strides = [1, 1]} : vector<16x8xf32> to vector<16x1xf32>
    %162 = vector.extract_strided_slice %158 {offsets = [0, 3], sizes = [16, 1], strides = [1, 1]} : vector<16x8xf32> to vector<16x1xf32>
    %163 = vector.extract_strided_slice %158 {offsets = [0, 4], sizes = [16, 1], strides = [1, 1]} : vector<16x8xf32> to vector<16x1xf32>
    %164 = vector.extract_strided_slice %158 {offsets = [0, 5], sizes = [16, 1], strides = [1, 1]} : vector<16x8xf32> to vector<16x1xf32>
    %165 = vector.extract_strided_slice %158 {offsets = [0, 6], sizes = [16, 1], strides = [1, 1]} : vector<16x8xf32> to vector<16x1xf32>
    %cst_39 = arith.constant dense<0.000000e+00> : vector<16x256xf32>
    %166 = tpu.matmul %155, %152, %cst_39 {dimension_numbers = #tpu.dot_dimension_numbers<[1], [0], [0], [1], [0, 0, 1, 1], [], []>} : vector<16x16xf32>, vector<16x256xf32>, vector<16x256xf32> -> vector<16x256xf32>
    %167 = vector.broadcast %159 : vector<16x1xf32> to vector<16x256xf32>
    %168 = arith.addf %166, %167 : vector<16x256xf32>
    %cst_40 = arith.constant 0.000000e+00 : f32
    %169 = vector.broadcast %cst_40 : f32 to vector<16x256xf32>
    %170 = arith.cmpf oge, %168, %169 : vector<16x256xf32>
    %171 = vector.broadcast %153 : f32 to vector<16x256xf32>
    %172 = arith.mulf %171, %168 : vector<16x256xf32>
    %173 = arith.select %170, %168, %172 : vector<16x256xi1>, vector<16x256xf32>
    %174 = vector.extract_strided_slice %173 {offsets = [0, 0], sizes = [16, 128], strides = [1, 1]} : vector<16x256xf32> to vector<16x128xf32>
    %175 = vector.shape_cast %174 : vector<16x128xf32> to vector<1x16x128xf32>
    %cst_41 = arith.constant dense<0.000000e+00> : vector<1xf32>
    %176 = vector.multi_reduction <add>, %175, %cst_41 [1, 2] : vector<1x16x128xf32> to vector<1xf32>
    %177 = vector.shape_cast %176 : vector<1xf32> to vector<1x1x1xf32>
    %178 = vector.extract %177[0, 0, 0] : f32 from vector<1x1x1xf32>
    %cst_42 = arith.constant 2.048000e+03 : f32
    %179 = arith.divf %178, %cst_42 : f32
    %180 = vector.broadcast %179 : f32 to vector<16x128xf32>
    %181 = arith.subf %174, %180 : vector<16x128xf32>
    %182 = arith.mulf %181, %181 : vector<16x128xf32>
    %183 = vector.shape_cast %182 : vector<16x128xf32> to vector<1x16x128xf32>
    %cst_43 = arith.constant dense<0.000000e+00> : vector<1xf32>
    %184 = vector.multi_reduction <add>, %183, %cst_43 [1, 2] : vector<1x16x128xf32> to vector<1xf32>
    %185 = vector.shape_cast %184 : vector<1xf32> to vector<1x1x1xf32>
    %186 = vector.extract %185[0, 0, 0] : f32 from vector<1x1x1xf32>
    %cst_44 = arith.constant 2.047000e+03 : f32
    %187 = arith.divf %186, %cst_44 : f32
    %188 = math.rsqrt %187 : f32
    %189 = vector.broadcast %188 : f32 to vector<16x1xf32>
    %190 = arith.mulf %160, %189 : vector<16x1xf32>
    %191 = vector.broadcast %190 : vector<16x1xf32> to vector<16x128xf32>
    %192 = arith.mulf %181, %191 : vector<16x128xf32>
    %193 = vector.broadcast %161 : vector<16x1xf32> to vector<16x128xf32>
    %194 = arith.addf %192, %193 : vector<16x128xf32>
    %195 = vector.extract_strided_slice %173 {offsets = [0, 128], sizes = [16, 128], strides = [1, 1]} : vector<16x256xf32> to vector<16x128xf32>
    %196 = vector.shape_cast %195 : vector<16x128xf32> to vector<1x16x128xf32>
    %cst_45 = arith.constant dense<0.000000e+00> : vector<1xf32>
    %197 = vector.multi_reduction <add>, %196, %cst_45 [1, 2] : vector<1x16x128xf32> to vector<1xf32>
    %198 = vector.shape_cast %197 : vector<1xf32> to vector<1x1x1xf32>
    %199 = vector.extract %198[0, 0, 0] : f32 from vector<1x1x1xf32>
    %cst_46 = arith.constant 2.048000e+03 : f32
    %200 = arith.divf %199, %cst_46 : f32
    %201 = vector.broadcast %200 : f32 to vector<16x128xf32>
    %202 = arith.subf %195, %201 : vector<16x128xf32>
    %203 = arith.mulf %202, %202 : vector<16x128xf32>
    %204 = vector.shape_cast %203 : vector<16x128xf32> to vector<1x16x128xf32>
    %cst_47 = arith.constant dense<0.000000e+00> : vector<1xf32>
    %205 = vector.multi_reduction <add>, %204, %cst_47 [1, 2] : vector<1x16x128xf32> to vector<1xf32>
    %206 = vector.shape_cast %205 : vector<1xf32> to vector<1x1x1xf32>
    %207 = vector.extract %206[0, 0, 0] : f32 from vector<1x1x1xf32>
    %cst_48 = arith.constant 2.047000e+03 : f32
    %208 = arith.divf %207, %cst_48 : f32
    %209 = math.rsqrt %208 : f32
    %210 = vector.broadcast %209 : f32 to vector<16x1xf32>
    %211 = arith.mulf %160, %210 : vector<16x1xf32>
    %212 = vector.broadcast %211 : vector<16x1xf32> to vector<16x128xf32>
    %213 = arith.mulf %202, %212 : vector<16x128xf32>
    %214 = vector.broadcast %161 : vector<16x1xf32> to vector<16x128xf32>
    %215 = arith.addf %213, %214 : vector<16x128xf32>
    %216 = tpu.concatenate %194, %215 in 1 : vector<16x128xf32>, vector<16x128xf32> -> vector<16x256xf32>
    %c2_i32 = arith.constant 2 : i32
    %217 = tpu.dynamic_rotate %216 by %c2_i32 dim 1 : vector<16x256xf32>, i32 -> vector<16x256xf32>
    %c2_i32_49 = arith.constant 2 : i32
    %218 = vector.broadcast %c2_i32_49 : i32 to vector<1x256xi32>
    %219 = arith.cmpi sge, %16, %218 : vector<1x256xi32>
    %cst_50 = arith.constant 0.000000e+00 : f32
    %220 = vector.shape_cast %219 : vector<1x256xi1> to vector<1x256xi1>
    %221 = vector.broadcast %220 : vector<1x256xi1> to vector<16x256xi1>
    %222 = vector.broadcast %cst_50 : f32 to vector<16x256xf32>
    %223 = arith.select %221, %217, %222 : vector<16x256xi1>, vector<16x256xf32>
    %c254_i32 = arith.constant 254 : i32
    %224 = tpu.dynamic_rotate %216 by %c254_i32 dim 1 : vector<16x256xf32>, i32 -> vector<16x256xf32>
    %c126_i32 = arith.constant 126 : i32
    %225 = vector.broadcast %c126_i32 : i32 to vector<1x256xi32>
    %226 = arith.cmpi slt, %16, %225 : vector<1x256xi32>
    %cst_51 = arith.constant 0.000000e+00 : f32
    %227 = vector.shape_cast %226 : vector<1x256xi1> to vector<1x256xi1>
    %228 = vector.broadcast %227 : vector<1x256xi1> to vector<16x256xi1>
    %229 = vector.broadcast %cst_51 : f32 to vector<16x256xf32>
    %230 = arith.select %228, %224, %229 : vector<16x256xi1>, vector<16x256xf32>
    %231 = tpu.concatenate %223, %216, %230 in 0 : vector<16x256xf32>, vector<16x256xf32>, vector<16x256xf32> -> vector<48x256xf32>
    %cst_52 = arith.constant dense<0.000000e+00> : vector<16x256xf32>
    %232 = tpu.matmul %156, %231, %cst_52 {dimension_numbers = #tpu.dot_dimension_numbers<[1], [0], [0], [1], [0, 0, 1, 1], [], []>} : vector<16x48xf32>, vector<48x256xf32>, vector<16x256xf32> -> vector<16x256xf32>
    %233 = vector.broadcast %162 : vector<16x1xf32> to vector<16x256xf32>
    %234 = arith.addf %232, %233 : vector<16x256xf32>
    %cst_53 = arith.constant 0.000000e+00 : f32
    %235 = vector.broadcast %cst_53 : f32 to vector<16x256xf32>
    %236 = arith.cmpf oge, %234, %235 : vector<16x256xf32>
    %237 = vector.broadcast %154 : f32 to vector<16x256xf32>
    %238 = arith.mulf %237, %234 : vector<16x256xf32>
    %239 = arith.select %236, %234, %238 : vector<16x256xi1>, vector<16x256xf32>
    %240 = vector.extract_strided_slice %239 {offsets = [0, 0], sizes = [16, 128], strides = [1, 1]} : vector<16x256xf32> to vector<16x128xf32>
    %241 = vector.shape_cast %240 : vector<16x128xf32> to vector<1x16x128xf32>
    %cst_54 = arith.constant dense<0.000000e+00> : vector<1xf32>
    %242 = vector.multi_reduction <add>, %241, %cst_54 [1, 2] : vector<1x16x128xf32> to vector<1xf32>
    %243 = vector.shape_cast %242 : vector<1xf32> to vector<1x1x1xf32>
    %244 = vector.extract %243[0, 0, 0] : f32 from vector<1x1x1xf32>
    %cst_55 = arith.constant 2.048000e+03 : f32
    %245 = arith.divf %244, %cst_55 : f32
    %246 = vector.broadcast %245 : f32 to vector<16x128xf32>
    %247 = arith.subf %240, %246 : vector<16x128xf32>
    %248 = arith.mulf %247, %247 : vector<16x128xf32>
    %249 = vector.shape_cast %248 : vector<16x128xf32> to vector<1x16x128xf32>
    %cst_56 = arith.constant dense<0.000000e+00> : vector<1xf32>
    %250 = vector.multi_reduction <add>, %249, %cst_56 [1, 2] : vector<1x16x128xf32> to vector<1xf32>
    %251 = vector.shape_cast %250 : vector<1xf32> to vector<1x1x1xf32>
    %252 = vector.extract %251[0, 0, 0] : f32 from vector<1x1x1xf32>
    %cst_57 = arith.constant 2.047000e+03 : f32
    %253 = arith.divf %252, %cst_57 : f32
    %254 = math.rsqrt %253 : f32
    %255 = vector.broadcast %254 : f32 to vector<16x1xf32>
    %256 = arith.mulf %163, %255 : vector<16x1xf32>
    %257 = vector.broadcast %256 : vector<16x1xf32> to vector<16x128xf32>
    %258 = arith.mulf %247, %257 : vector<16x128xf32>
    %259 = vector.broadcast %164 : vector<16x1xf32> to vector<16x128xf32>
    %260 = arith.addf %258, %259 : vector<16x128xf32>
    %261 = vector.extract_strided_slice %239 {offsets = [0, 128], sizes = [16, 128], strides = [1, 1]} : vector<16x256xf32> to vector<16x128xf32>
    %262 = vector.shape_cast %261 : vector<16x128xf32> to vector<1x16x128xf32>
    %cst_58 = arith.constant dense<0.000000e+00> : vector<1xf32>
    %263 = vector.multi_reduction <add>, %262, %cst_58 [1, 2] : vector<1x16x128xf32> to vector<1xf32>
    %264 = vector.shape_cast %263 : vector<1xf32> to vector<1x1x1xf32>
    %265 = vector.extract %264[0, 0, 0] : f32 from vector<1x1x1xf32>
    %cst_59 = arith.constant 2.048000e+03 : f32
    %266 = arith.divf %265, %cst_59 : f32
    %267 = vector.broadcast %266 : f32 to vector<16x128xf32>
    %268 = arith.subf %261, %267 : vector<16x128xf32>
    %269 = arith.mulf %268, %268 : vector<16x128xf32>
    %270 = vector.shape_cast %269 : vector<16x128xf32> to vector<1x16x128xf32>
    %cst_60 = arith.constant dense<0.000000e+00> : vector<1xf32>
    %271 = vector.multi_reduction <add>, %270, %cst_60 [1, 2] : vector<1x16x128xf32> to vector<1xf32>
    %272 = vector.shape_cast %271 : vector<1xf32> to vector<1x1x1xf32>
    %273 = vector.extract %272[0, 0, 0] : f32 from vector<1x1x1xf32>
    %cst_61 = arith.constant 2.047000e+03 : f32
    %274 = arith.divf %273, %cst_61 : f32
    %275 = math.rsqrt %274 : f32
    %276 = vector.broadcast %275 : f32 to vector<16x1xf32>
    %277 = arith.mulf %163, %276 : vector<16x1xf32>
    %278 = vector.broadcast %277 : vector<16x1xf32> to vector<16x128xf32>
    %279 = arith.mulf %268, %278 : vector<16x128xf32>
    %280 = vector.broadcast %164 : vector<16x1xf32> to vector<16x128xf32>
    %281 = arith.addf %279, %280 : vector<16x128xf32>
    %282 = tpu.concatenate %260, %281 in 1 : vector<16x128xf32>, vector<16x128xf32> -> vector<16x256xf32>
    %cst_62 = arith.constant dense<0.000000e+00> : vector<16x256xf32>
    %283 = tpu.matmul %157, %282, %cst_62 {dimension_numbers = #tpu.dot_dimension_numbers<[1], [0], [0], [1], [0, 0, 1, 1], [], []>} : vector<16x16xf32>, vector<16x256xf32>, vector<16x256xf32> -> vector<16x256xf32>
    %284 = vector.broadcast %165 : vector<16x1xf32> to vector<16x256xf32>
    %285 = arith.addf %283, %284 : vector<16x256xf32>
    %286 = arith.addf %152, %285 : vector<16x256xf32>
    %c4 = arith.constant 4 : index
    %287 = memref.load %arg0[%c4] : memref<6xf32, #tpu.memory_space<smem>>
    %c5 = arith.constant 5 : index
    %288 = memref.load %arg0[%c5] : memref<6xf32, #tpu.memory_space<smem>>
    %c0_63 = arith.constant 0 : index
    %c0_64 = arith.constant 0 : index
    %289 = vector.load %arg4[%c0_63, %c0_64] : memref<16x88xf32, #tpu.memory_space<vmem>>, vector<16x16xf32>
    %c0_65 = arith.constant 0 : index
    %c16_66 = arith.constant 16 : index
    %290 = vector.load %arg4[%c0_65, %c16_66] : memref<16x88xf32, #tpu.memory_space<vmem>>, vector<16x48xf32>
    %c0_67 = arith.constant 0 : index
    %c64_68 = arith.constant 64 : index
    %291 = vector.load %arg4[%c0_67, %c64_68] : memref<16x88xf32, #tpu.memory_space<vmem>>, vector<16x16xf32>
    %c0_69 = arith.constant 0 : index
    %c80_70 = arith.constant 80 : index
    %292 = vector.load %arg4[%c0_69, %c80_70] : memref<16x88xf32, #tpu.memory_space<vmem>>, vector<16x8xf32>
    %293 = vector.extract_strided_slice %292 {offsets = [0, 0], sizes = [16, 1], strides = [1, 1]} : vector<16x8xf32> to vector<16x1xf32>
    %294 = vector.extract_strided_slice %292 {offsets = [0, 1], sizes = [16, 1], strides = [1, 1]} : vector<16x8xf32> to vector<16x1xf32>
    %295 = vector.extract_strided_slice %292 {offsets = [0, 2], sizes = [16, 1], strides = [1, 1]} : vector<16x8xf32> to vector<16x1xf32>
    %296 = vector.extract_strided_slice %292 {offsets = [0, 3], sizes = [16, 1], strides = [1, 1]} : vector<16x8xf32> to vector<16x1xf32>
    %297 = vector.extract_strided_slice %292 {offsets = [0, 4], sizes = [16, 1], strides = [1, 1]} : vector<16x8xf32> to vector<16x1xf32>
    %298 = vector.extract_strided_slice %292 {offsets = [0, 5], sizes = [16, 1], strides = [1, 1]} : vector<16x8xf32> to vector<16x1xf32>
    %299 = vector.extract_strided_slice %292 {offsets = [0, 6], sizes = [16, 1], strides = [1, 1]} : vector<16x8xf32> to vector<16x1xf32>
    %cst_71 = arith.constant dense<0.000000e+00> : vector<16x256xf32>
    %300 = tpu.matmul %289, %286, %cst_71 {dimension_numbers = #tpu.dot_dimension_numbers<[1], [0], [0], [1], [0, 0, 1, 1], [], []>} : vector<16x16xf32>, vector<16x256xf32>, vector<16x256xf32> -> vector<16x256xf32>
    %301 = vector.broadcast %293 : vector<16x1xf32> to vector<16x256xf32>
    %302 = arith.addf %300, %301 : vector<16x256xf32>
    %cst_72 = arith.constant 0.000000e+00 : f32
    %303 = vector.broadcast %cst_72 : f32 to vector<16x256xf32>
    %304 = arith.cmpf oge, %302, %303 : vector<16x256xf32>
    %305 = vector.broadcast %287 : f32 to vector<16x256xf32>
    %306 = arith.mulf %305, %302 : vector<16x256xf32>
    %307 = arith.select %304, %302, %306 : vector<16x256xi1>, vector<16x256xf32>
    %308 = vector.extract_strided_slice %307 {offsets = [0, 0], sizes = [16, 128], strides = [1, 1]} : vector<16x256xf32> to vector<16x128xf32>
    %309 = vector.shape_cast %308 : vector<16x128xf32> to vector<1x16x128xf32>
    %cst_73 = arith.constant dense<0.000000e+00> : vector<1xf32>
    %310 = vector.multi_reduction <add>, %309, %cst_73 [1, 2] : vector<1x16x128xf32> to vector<1xf32>
    %311 = vector.shape_cast %310 : vector<1xf32> to vector<1x1x1xf32>
    %312 = vector.extract %311[0, 0, 0] : f32 from vector<1x1x1xf32>
    %cst_74 = arith.constant 2.048000e+03 : f32
    %313 = arith.divf %312, %cst_74 : f32
    %314 = vector.broadcast %313 : f32 to vector<16x128xf32>
    %315 = arith.subf %308, %314 : vector<16x128xf32>
    %316 = arith.mulf %315, %315 : vector<16x128xf32>
    %317 = vector.shape_cast %316 : vector<16x128xf32> to vector<1x16x128xf32>
    %cst_75 = arith.constant dense<0.000000e+00> : vector<1xf32>
    %318 = vector.multi_reduction <add>, %317, %cst_75 [1, 2] : vector<1x16x128xf32> to vector<1xf32>
    %319 = vector.shape_cast %318 : vector<1xf32> to vector<1x1x1xf32>
    %320 = vector.extract %319[0, 0, 0] : f32 from vector<1x1x1xf32>
    %cst_76 = arith.constant 2.047000e+03 : f32
    %321 = arith.divf %320, %cst_76 : f32
    %322 = math.rsqrt %321 : f32
    %323 = vector.broadcast %322 : f32 to vector<16x1xf32>
    %324 = arith.mulf %294, %323 : vector<16x1xf32>
    %325 = vector.broadcast %324 : vector<16x1xf32> to vector<16x128xf32>
    %326 = arith.mulf %315, %325 : vector<16x128xf32>
    %327 = vector.broadcast %295 : vector<16x1xf32> to vector<16x128xf32>
    %328 = arith.addf %326, %327 : vector<16x128xf32>
    %329 = vector.extract_strided_slice %307 {offsets = [0, 128], sizes = [16, 128], strides = [1, 1]} : vector<16x256xf32> to vector<16x128xf32>
    %330 = vector.shape_cast %329 : vector<16x128xf32> to vector<1x16x128xf32>
    %cst_77 = arith.constant dense<0.000000e+00> : vector<1xf32>
    %331 = vector.multi_reduction <add>, %330, %cst_77 [1, 2] : vector<1x16x128xf32> to vector<1xf32>
    %332 = vector.shape_cast %331 : vector<1xf32> to vector<1x1x1xf32>
    %333 = vector.extract %332[0, 0, 0] : f32 from vector<1x1x1xf32>
    %cst_78 = arith.constant 2.048000e+03 : f32
    %334 = arith.divf %333, %cst_78 : f32
    %335 = vector.broadcast %334 : f32 to vector<16x128xf32>
    %336 = arith.subf %329, %335 : vector<16x128xf32>
    %337 = arith.mulf %336, %336 : vector<16x128xf32>
    %338 = vector.shape_cast %337 : vector<16x128xf32> to vector<1x16x128xf32>
    %cst_79 = arith.constant dense<0.000000e+00> : vector<1xf32>
    %339 = vector.multi_reduction <add>, %338, %cst_79 [1, 2] : vector<1x16x128xf32> to vector<1xf32>
    %340 = vector.shape_cast %339 : vector<1xf32> to vector<1x1x1xf32>
    %341 = vector.extract %340[0, 0, 0] : f32 from vector<1x1x1xf32>
    %cst_80 = arith.constant 2.047000e+03 : f32
    %342 = arith.divf %341, %cst_80 : f32
    %343 = math.rsqrt %342 : f32
    %344 = vector.broadcast %343 : f32 to vector<16x1xf32>
    %345 = arith.mulf %294, %344 : vector<16x1xf32>
    %346 = vector.broadcast %345 : vector<16x1xf32> to vector<16x128xf32>
    %347 = arith.mulf %336, %346 : vector<16x128xf32>
    %348 = vector.broadcast %295 : vector<16x1xf32> to vector<16x128xf32>
    %349 = arith.addf %347, %348 : vector<16x128xf32>
    %350 = tpu.concatenate %328, %349 in 1 : vector<16x128xf32>, vector<16x128xf32> -> vector<16x256xf32>
    %c4_i32 = arith.constant 4 : i32
    %351 = tpu.dynamic_rotate %350 by %c4_i32 dim 1 : vector<16x256xf32>, i32 -> vector<16x256xf32>
    %c4_i32_81 = arith.constant 4 : i32
    %352 = vector.broadcast %c4_i32_81 : i32 to vector<1x256xi32>
    %353 = arith.cmpi sge, %16, %352 : vector<1x256xi32>
    %cst_82 = arith.constant 0.000000e+00 : f32
    %354 = vector.shape_cast %353 : vector<1x256xi1> to vector<1x256xi1>
    %355 = vector.broadcast %354 : vector<1x256xi1> to vector<16x256xi1>
    %356 = vector.broadcast %cst_82 : f32 to vector<16x256xf32>
    %357 = arith.select %355, %351, %356 : vector<16x256xi1>, vector<16x256xf32>
    %c252_i32 = arith.constant 252 : i32
    %358 = tpu.dynamic_rotate %350 by %c252_i32 dim 1 : vector<16x256xf32>, i32 -> vector<16x256xf32>
    %c124_i32 = arith.constant 124 : i32
    %359 = vector.broadcast %c124_i32 : i32 to vector<1x256xi32>
    %360 = arith.cmpi slt, %16, %359 : vector<1x256xi32>
    %cst_83 = arith.constant 0.000000e+00 : f32
    %361 = vector.shape_cast %360 : vector<1x256xi1> to vector<1x256xi1>
    %362 = vector.broadcast %361 : vector<1x256xi1> to vector<16x256xi1>
    %363 = vector.broadcast %cst_83 : f32 to vector<16x256xf32>
    %364 = arith.select %362, %358, %363 : vector<16x256xi1>, vector<16x256xf32>
    %365 = tpu.concatenate %357, %350, %364 in 0 : vector<16x256xf32>, vector<16x256xf32>, vector<16x256xf32> -> vector<48x256xf32>
    %cst_84 = arith.constant dense<0.000000e+00> : vector<16x256xf32>
    %366 = tpu.matmul %290, %365, %cst_84 {dimension_numbers = #tpu.dot_dimension_numbers<[1], [0], [0], [1], [0, 0, 1, 1], [], []>} : vector<16x48xf32>, vector<48x256xf32>, vector<16x256xf32> -> vector<16x256xf32>
    %367 = vector.broadcast %296 : vector<16x1xf32> to vector<16x256xf32>
    %368 = arith.addf %366, %367 : vector<16x256xf32>
    %cst_85 = arith.constant 0.000000e+00 : f32
    %369 = vector.broadcast %cst_85 : f32 to vector<16x256xf32>
    %370 = arith.cmpf oge, %368, %369 : vector<16x256xf32>
    %371 = vector.broadcast %288 : f32 to vector<16x256xf32>
    %372 = arith.mulf %371, %368 : vector<16x256xf32>
    %373 = arith.select %370, %368, %372 : vector<16x256xi1>, vector<16x256xf32>
    %374 = vector.extract_strided_slice %373 {offsets = [0, 0], sizes = [16, 128], strides = [1, 1]} : vector<16x256xf32> to vector<16x128xf32>
    %375 = vector.shape_cast %374 : vector<16x128xf32> to vector<1x16x128xf32>
    %cst_86 = arith.constant dense<0.000000e+00> : vector<1xf32>
    %376 = vector.multi_reduction <add>, %375, %cst_86 [1, 2] : vector<1x16x128xf32> to vector<1xf32>
    %377 = vector.shape_cast %376 : vector<1xf32> to vector<1x1x1xf32>
    %378 = vector.extract %377[0, 0, 0] : f32 from vector<1x1x1xf32>
    %cst_87 = arith.constant 2.048000e+03 : f32
    %379 = arith.divf %378, %cst_87 : f32
    %380 = vector.broadcast %379 : f32 to vector<16x128xf32>
    %381 = arith.subf %374, %380 : vector<16x128xf32>
    %382 = arith.mulf %381, %381 : vector<16x128xf32>
    %383 = vector.shape_cast %382 : vector<16x128xf32> to vector<1x16x128xf32>
    %cst_88 = arith.constant dense<0.000000e+00> : vector<1xf32>
    %384 = vector.multi_reduction <add>, %383, %cst_88 [1, 2] : vector<1x16x128xf32> to vector<1xf32>
    %385 = vector.shape_cast %384 : vector<1xf32> to vector<1x1x1xf32>
    %386 = vector.extract %385[0, 0, 0] : f32 from vector<1x1x1xf32>
    %cst_89 = arith.constant 2.047000e+03 : f32
    %387 = arith.divf %386, %cst_89 : f32
    %388 = math.rsqrt %387 : f32
    %389 = vector.broadcast %388 : f32 to vector<16x1xf32>
    %390 = arith.mulf %297, %389 : vector<16x1xf32>
    %391 = vector.broadcast %390 : vector<16x1xf32> to vector<16x128xf32>
    %392 = arith.mulf %381, %391 : vector<16x128xf32>
    %393 = vector.broadcast %298 : vector<16x1xf32> to vector<16x128xf32>
    %394 = arith.addf %392, %393 : vector<16x128xf32>
    %395 = vector.extract_strided_slice %373 {offsets = [0, 128], sizes = [16, 128], strides = [1, 1]} : vector<16x256xf32> to vector<16x128xf32>
    %396 = vector.shape_cast %395 : vector<16x128xf32> to vector<1x16x128xf32>
    %cst_90 = arith.constant dense<0.000000e+00> : vector<1xf32>
    %397 = vector.multi_reduction <add>, %396, %cst_90 [1, 2] : vector<1x16x128xf32> to vector<1xf32>
    %398 = vector.shape_cast %397 : vector<1xf32> to vector<1x1x1xf32>
    %399 = vector.extract %398[0, 0, 0] : f32 from vector<1x1x1xf32>
    %cst_91 = arith.constant 2.048000e+03 : f32
    %400 = arith.divf %399, %cst_91 : f32
    %401 = vector.broadcast %400 : f32 to vector<16x128xf32>
    %402 = arith.subf %395, %401 : vector<16x128xf32>
    %403 = arith.mulf %402, %402 : vector<16x128xf32>
    %404 = vector.shape_cast %403 : vector<16x128xf32> to vector<1x16x128xf32>
    %cst_92 = arith.constant dense<0.000000e+00> : vector<1xf32>
    %405 = vector.multi_reduction <add>, %404, %cst_92 [1, 2] : vector<1x16x128xf32> to vector<1xf32>
    %406 = vector.shape_cast %405 : vector<1xf32> to vector<1x1x1xf32>
    %407 = vector.extract %406[0, 0, 0] : f32 from vector<1x1x1xf32>
    %cst_93 = arith.constant 2.047000e+03 : f32
    %408 = arith.divf %407, %cst_93 : f32
    %409 = math.rsqrt %408 : f32
    %410 = vector.broadcast %409 : f32 to vector<16x1xf32>
    %411 = arith.mulf %297, %410 : vector<16x1xf32>
    %412 = vector.broadcast %411 : vector<16x1xf32> to vector<16x128xf32>
    %413 = arith.mulf %402, %412 : vector<16x128xf32>
    %414 = vector.broadcast %298 : vector<16x1xf32> to vector<16x128xf32>
    %415 = arith.addf %413, %414 : vector<16x128xf32>
    %416 = tpu.concatenate %394, %415 in 1 : vector<16x128xf32>, vector<16x128xf32> -> vector<16x256xf32>
    %cst_94 = arith.constant dense<0.000000e+00> : vector<16x256xf32>
    %417 = tpu.matmul %291, %416, %cst_94 {dimension_numbers = #tpu.dot_dimension_numbers<[1], [0], [0], [1], [0, 0, 1, 1], [], []>} : vector<16x16xf32>, vector<16x256xf32>, vector<16x256xf32> -> vector<16x256xf32>
    %418 = vector.broadcast %299 : vector<16x1xf32> to vector<16x256xf32>
    %419 = arith.addf %417, %418 : vector<16x256xf32>
    %420 = arith.addf %286, %419 : vector<16x256xf32>
    %c0_95 = arith.constant 0 : index
    %c0_96 = arith.constant 0 : index
    %421 = vector.load %arg5[%c0_95, %c0_96] : memref<16x256xf32, #tpu.memory_space<vmem>>, vector<16x256xf32>
    tpu.vector_store %arg5[%c0_95, %c0_96], %420 {strides = array<i32>} : memref<16x256xf32, #tpu.memory_space<vmem>>, vector<16x256xf32>,
    return
  }
}

</mosaic_0001>

<bundles_post_ra>
// kernel: tpu_custom_call.1
= control target key start
LH: loop header
LB: loop body
LE: loop exit
PB: predicated region body
PF: predicated region fallthrough
CT: control target
= control target key end

     0   :  { %10 = vsyncpa [#allocation5], 0  ;;  %s3267_s0 = inlined_call_operand.hbm [shape: f32[6], index: 0, kind: input, shape index: {}]   ;;  %s3268_s1 = inlined_call_operand.hbm [shape: f32[32,256], index: 1, kind: input, shape index: {}]   ;;  %s3269_s2 = inlined_call_operand.hbm [shape: f32[32,168], index: 2, kind: input, shape index: {}]   ;;  %s3270_s3 = inlined_call_operand.hbm [shape: f32[16,88], index: 3, kind: input, shape index: {}]   ;;  %s3271_s4 = inlined_call_operand.hbm [shape: f32[16,88], index: 4, kind: input, shape index: {}]   ;;  %s3272_s5 = inlined_call_operand.hbm [shape: f32[16,256], index: 5, kind: output, shape index: {}]  }
   0x1   :  { %11 = vsyncpa [#allocation3], 0 }
   0x2   :  { %12 = vsyncpa [#allocation8], 0 }
   0x3   :  { %13 = vsyncpa [#allocation11], 0 }
   0x4   :  { %14 = vsyncpa [#allocation4], 0  ;;  %s41_s20 = sshll.u32 %s3269_s2, 4  ;;  %s2528_s21 = smov [#allocation7]   ;;  %s42_s20 = int_to_ptr.hbm [resolvable:$true] %s41_s20 }
   0x5   :  { %s43_s22 = sshll.u32 %s2528_s21, 4  ;;  %s20_s25 = sshll.u32 %s3267_s0, 4  ;;  %s44_s22 = int_to_ptr.vmem [resolvable:$true] %s43_s22  ;;  %s21_s25 = int_to_ptr.hbm [resolvable:$true] %s20_s25 }
   0x6   :  { %s2529_s26 = smov 256   ;;  %s2530_s27 = smov 16  }
   0x7   :  { %49 = dma.hbm_to_vmem [thread:$0]  %s42_s20, 1024, %s44_s22, [#allocation8], %s2529_s26, %s2529_s26, %s2530_s27  }
   0x8   :  { %s2531_s28 = smov [#allocation2]   ;;  %s28_s2 = sshll.u32 %s3268_s1, 4  ;;  %s29_s2 = int_to_ptr.hbm [resolvable:$true] %s28_s2 }
   0x9   :  { %23 = dma.hbm_to_smem %s21_s25, 16, %s2531_s28, [#allocation5]  }
   0xa   :  { %s2532_s6 = smov [#allocation6]   ;;  %s54_s0 = sshll.u32 %s3270_s3, 4  ;;  %s55_s0 = int_to_ptr.hbm [resolvable:$true] %s54_s0 }
   0xb   :  { %s30_s7 = sshll.u32 %s2532_s6, 4  ;;  %s2533_s10 = smov [#allocation9]   ;;  %s31_s7 = int_to_ptr.vmem [resolvable:$true] %s30_s7 }
   0xc   :  { %36 = dma.hbm_to_vmem [thread:$0]  %s29_s2, 1024, %s31_s7, [#allocation3], %s2529_s26, %s2529_s26, %s2530_s27  }
   0xd   :  { %s56_s11 = sshll.u32 %s2533_s10, 4  ;;  %s2534_s12 = smov 128   ;;  %s57_s11 = int_to_ptr.vmem [resolvable:$true] %s56_s11 }
   0xe   :  { %s2535_s13 = smov 8   ;;  %s67_s15 = sshll.u32 %s3271_s4, 4  ;;  %s68_s15 = int_to_ptr.hbm [resolvable:$true] %s67_s15 }
   0xf   :  { %62 = dma.hbm_to_vmem [thread:$0]  %s55_s0, 256, %s57_s11, [#allocation8], %s2534_s12, %s2534_s12, %s2535_s13  }
  0x10   :  { %s2536_s16 = smov [#allocation10]  }
  0x11   :  { %s69_s17 = sshll.u32 %s2536_s16, 4  ;;  %s70_s17 = int_to_ptr.vmem [resolvable:$true] %s69_s17 }
  0x12   :  { %75 = dma.hbm_to_vmem [thread:$0]  %s68_s15, 256, %s70_s17, [#allocation11], %s2534_s12, %s2534_s12, %s2535_s13  }
  0x13   :  { %2518 = dma.done.wait [#allocation5], 16  }
  0x14   :  { %2519 = vsyncadd [#allocation5], 4294967280 }
  0x15   :  { %2520 = dma.done.wait [#allocation3], 1024  }
  0x16   :  { %2521 = vsyncadd [#allocation3], 4294966272 }
  0x17   :  { %2522 = dma.done.wait [#allocation8], 1280  }
  0x18   :  { %2523 = vsyncadd [#allocation8], 4294966016 }
  0x19   :  { %2524 = dma.done.wait [#allocation11], 256  }
  0x1a   :  { %2525 = vsyncadd [#allocation11], 4294967040 }
  0x1b   :  { %96 = sfence }
  0x1c   :  { %v130_v0 = vld [vmem:[#allocation6 + $0x30] sm:$0xff]  ;;  %v131_v1 = vld [vmem:[#allocation6 + $0x38] sm:$0xff]  ;;  %v128_v2 = vld [vmem:[#allocation6 + $0x20] sm:$0xff]  ;;  %v2537_v6 = vmov 32   ;;  %vm162_vm0 = vcmask 261120   ;;  %s132_s3 = sld [smem:[#allocation2]] }
  0x1d   :  { %187 = vmatpush.msra.mxu0 %v130_v0  ;;  %216 = vmatpush.msra.mxu1 %v131_v1  ;;  %v129_v3 = vld [vmem:[#allocation6 + $0x28] sm:$0xff]  ;;  %v126_v4 = vld [vmem:[#allocation6 + $0x10] sm:$0xff]  ;;  %v127_v5 = vld [vmem:[#allocation6 + $0x18] sm:$0xff]  ;;  %v2538_v60 = vmov 4096.0   ;;  %s2542_s2 = smov 127   ;;  %s2543_s6 = smov 1  }
  0x1e   :  { %2292 = vset.pattern.permute.xlu0 %v2537_v6  ;;  %2293 = vset.pattern.permute.xlu1 %v2537_v6  ;;  %v2616_v7 = vld [vmem:[#allocation7 + $0x8] sm:$0xff]  ;;  %v124_v8 = vld [vmem:[#allocation6] sm:$0xff]  ;;  %v2628_v12 = vld [vmem:[#allocation7 + $0x18] sm:$0xff]  ;;  %2346 = vrcp.f32 %v2538_v60  ;;  %s2544_s7 = smov 96   ;;  %s2094_s8 = sld [smem:[#allocation2 + $0x1]] }
  0x1f   :  { %188 = vmatpush.msra.mxu0 %v128_v2  ;;  %217 = vmatpush.msra.mxu1 %v129_v3  ;;  %v125_v9 = vld [vmem:[#allocation6 + $0x8] sm:$0xff]  ;;  %v2621_v11 = vld [vmem:[#allocation7] sm:$0xff]  ;;  %v2630_v13 = vld [vmem:[#allocation7 + $0x38] sm:$0xff]  ;;  %s2131_s17 = sld [smem:[#allocation2 + $0x2]] }
  0x20   :  { %144 = vperm.xlu0 %2292, %v2616_v7   ;;  %v2619_v10 = vld [vmem:[#allocation7 + $0x28] sm:$0xff]  ;;  %v2633_v14 = vld [vmem:[#allocation7 + $0x10] sm:$0xff]  ;;  %v2640_v15 = vld [vmem:[#allocation7 + $0x20] sm:$0xff] }
  0x21   :  { %189 = vmatpush.msra.mxu0 %v126_v4  ;;  %218 = vmatpush.msra.mxu1 %v127_v5  ;;  %v2646_v16 = vld [vmem:[#allocation7 + $0x30] sm:$0xff] }
  0x22   :  { %154 = vperm.xlu1 %2293, %v2619_v10   ;;  %v241_v30 = vstv %s132_s3 }
  0x23   :  { %190 = vmatpush.msra.mxu0 %v124_v8  ;;  %219 = vmatpush.msra.mxu1 %v125_v9 }
  0x24   :  { %2095 = vmatmul.msk.f32.vlgmr.msra.gmra.mxu0 %vm162_vm0, %v2621_v11  ;;  %2099 = vmatmul.msk.f32.vlgmr.msra.gmra.mxu1 %vm162_vm0, %v2621_v11  ;;  %v2347_v61 = vpop.eup %2346 }
  0x25   :  { %v271_v62 = vmul.f32 4096.0, %v2347_v61  ;;  %vm275_vm9 = vweird.f32 %v2347_v61 }
  0x27   :  { %v272_v63 = vsub.f32 1.0, %v271_v62 }
  0x28   :  { %149 = vperm.xlu0 %2292, %v2628_v12  }
  0x29   :  { %v273_v3 = vmul.f32 %v2347_v61, %v272_v63  ;;  %v2540_v63 = vmov 33  }
  0x2a   :  { %159 = vperm.xlu1 %2293, %v2630_v13   ;;  %2294 = vset.pattern.permute.xlu2 %v2540_v63 }
  0x2b   :  { %v274_v6 = vadd.f32 %v2347_v61, %v273_v3 }
  0x2c   :  { %2096 = vmatmul.msk.f32.gmra.mxu0 %vm162_vm0, %v2633_v14  ;;  %2100 = vmatmul.msk.f32.gmra.mxu1 %vm162_vm0, %v2633_v14 }
  0x30   :  { %2297 = vset.pattern.permute.xlu0 %v2540_v63 }
  0x32   :  { %2298 = vset.pattern.permute.xlu1 %v2540_v63 }
  0x34   :  { %2097 = vmatmul.msk.f32.gmra.mxu0 %vm162_vm0, %v2640_v15  ;;  %2101 = vmatmul.msk.f32.gmra.mxu1 %vm162_vm0, %v2640_v15 }
  0x3c   :  { %2098 = vmatmul.msk.f32.gmra.mxu0 %vm162_vm0, %v2646_v16  ;;  %2102 = vmatmul.msk.f32.gmra.mxu1 %vm162_vm0, %v2646_v16 }
  0x92   :  { %v145_v19 = vpop.permute.xlu0 %144 }
  0x94   :  { %v155_v23 = vpop.permute.xlu1 %154 }
  0x9a   :  { %v150_v22 = vpop.permute.xlu0 %149 }
  0x9c   :  { %v160_v41 = vpop.permute.xlu1 %159 }
  0xa1   :  { %v192_v17 = vpop.f32.mrf.mxu0  ;;  %v221_v18 = vpop.f32.mrf.mxu1 }
  0xa2   :  { %v222_v24 = vadd.f32 %v221_v18, %v145_v19  ;;  %v193_v27 = vadd.f32 %v192_v17, %v145_v19  ;;  %v276_v17 = vsel %vm275_vm9, %v2347_v61, %v274_v6 }
  0xa4   :  { %v243_v33 = vmul.f32 %v241_v30, %v222_v24  ;;  %v242_v36 = vmul.f32 %v241_v30, %v193_v27  ;;  %vm234_vm1 = vcmp.ge.f32.partialorder %v222_v24, 0.0  ;;  %vm233_vm4 = vcmp.ge.f32.partialorder %v193_v27, 0.0 }
  0xa6   :  { %v2652_v39 = vsel %vm234_vm1, %v222_v24, %v243_v33  ;;  %v250_v45 = vsel %vm233_vm4, %v193_v27, %v242_v36 }
  0xa9   :  { %v195_v20 = vpop.f32.mrf.mxu0  ;;  %v224_v21 = vpop.f32.mrf.mxu1 }
  0xaa   :  { %v196_v25 = vadd.f32 %v195_v20, %v150_v22  ;;  %v225_v26 = vadd.f32 %v224_v21, %v150_v22 }
  0xac   :  { %v244_v34 = vmul.f32 %v241_v30, %v196_v25  ;;  %v245_v35 = vmul.f32 %v241_v30, %v225_v26  ;;  %vm235_vm2 = vcmp.ge.f32.partialorder %v196_v25, 0.0  ;;  %vm236_vm3 = vcmp.ge.f32.partialorder %v225_v26, 0.0 }
  0xae   :  { %v2654_v40 = vsel %vm236_vm3, %v225_v26, %v245_v35  ;;  %v252_v42 = vsel %vm235_vm2, %v196_v25, %v244_v34 }
  0xaf   :  { %v370_v50 = vadd.f32 %v2654_v40, %v2652_v39  ;;  %v258_v51 = vadd.f32 %v252_v42, %v250_v45 }
  0xb1   :  { %v198_v28 = vpop.f32.mrf.mxu0  ;;  %v227_v29 = vpop.f32.mrf.mxu1 }
  0xb2   :  { %v199_v31 = vadd.f32 %v198_v28, %v155_v23  ;;  %v228_v32 = vadd.f32 %v227_v29, %v155_v23 }
  0xb4   :  { %v246_v37 = vmul.f32 %v241_v30, %v199_v31  ;;  %v247_v38 = vmul.f32 %v241_v30, %v228_v32  ;;  %vm237_vm5 = vcmp.ge.f32.partialorder %v199_v31, 0.0  ;;  %vm238_vm6 = vcmp.ge.f32.partialorder %v228_v32, 0.0 }
  0xb6   :  { %v2656_v48 = vsel %vm238_vm6, %v228_v32, %v247_v38  ;;  %v254_v49 = vsel %vm237_vm5, %v199_v31, %v246_v37 }
  0xb7   :  { %v371_v54 = vadd.f32 %v370_v50, %v2656_v48  ;;  %v259_v55 = vadd.f32 %v258_v51, %v254_v49 }
  0xb9   :  { %v201_v43 = vpop.f32.mrf.mxu0  ;;  %v230_v44 = vpop.f32.mrf.mxu1 }
  0xba   :  { %v202_v46 = vadd.f32 %v201_v43, %v160_v41  ;;  %v231_v47 = vadd.f32 %v230_v44, %v160_v41 }
  0xbc   :  { %v248_v52 = vmul.f32 %v241_v30, %v202_v46  ;;  %v249_v53 = vmul.f32 %v241_v30, %v231_v47  ;;  %vm240_vm7 = vcmp.ge.f32.partialorder %v231_v47, 0.0  ;;  %vm239_vm8 = vcmp.ge.f32.partialorder %v202_v46, 0.0 }
  0xbd   :  { %v2539_v30 = vmov 4095.0  }
  0xbe   :  { %v2661_v56 = vsel %vm240_vm7, %v231_v47, %v249_v53  ;;  %v256_v57 = vsel %vm239_vm8, %v202_v46, %v248_v52  ;;  %2348 = vrcp.f32 %v2539_v30  ;;  %vm568_vm7 = vcmask 785408  }
  0xbf   :  { %v372_v58 = vadd.f32 %v371_v54, %v2661_v56  ;;  %v260_v59 = vadd.f32 %v259_v55, %v256_v57 }
  0xc1   :  { %373 = vadd.xlane.f32.xlu0 %v372_v58  ;;  %261 = vadd.xlane.f32.xlu2 %v260_v59 }
  0xc4   :  { %v2349_v31 = vpop.eup %2348 }
  0xc5   :  { %v301_v32 = vmul.f32 4095.0, %v2349_v31  ;;  %vm305_vm10 = vweird.f32 %v2349_v31 }
  0xc7   :  { %v302_v33 = vsub.f32 1.0, %v301_v32 }
  0xc9   :  { %v303_v37 = vmul.f32 %v2349_v31, %v302_v33 }
 0x134   :  { %v262_v0 = vpop.xlane.xlu2 %261  ;;  %v374_v46 = vpop.xlane.xlu0 %373 }
 0x135   :  { %v263_v1 = vrot.slane %v262_v0, 4  ;;  %v375_v47 = vrot.slane %v374_v46, 4 }
 0x137   :  { %v264_v2 = vadd.f32 %v263_v1, %v262_v0  ;;  %v376_v50 = vadd.f32 %v375_v47, %v374_v46 }
 0x139   :  { %v265_v4 = vrot.slane %v264_v2, 2  ;;  %v377_v51 = vrot.slane %v376_v50, 2 }
 0x13b   :  { %v266_v5 = vadd.f32 %v265_v4, %v264_v2  ;;  %v378_v55 = vadd.f32 %v377_v51, %v376_v50 }
 0x13d   :  { %v267_v8 = vrot.slane %v266_v5, 1  ;;  %v379_v59 = vrot.slane %v378_v55, 1 }
 0x13f   :  { %v268_v9 = vadd.f32 %v267_v8, %v266_v5  ;;  %v380_v62 = vadd.f32 %v379_v59, %v378_v55 }
 0x141   :  { %2175 = vpush %v268_v9 }
 0x142   :  { %2177 = vpush %v276_v17 }
 0x172   :  { %s2176_s4 = spop %2175 }
 0x173   :  { %s2664_s18 = spop %2177 }
 0x174   :  { %s278_s19 = smul.f32 %s2664_s18, %s2176_s4 }
 0x176   :  { %v279_v18 = vstv %s278_s19 }
 0x177   :  { %v2667_v19 = vsub.f32 %v250_v45, %v279_v18  ;;  %v2669_v20 = vsub.f32 %v252_v42, %v279_v18  ;;  %v2671_v21 = vsub.f32 %v254_v49, %v279_v18  ;;  %v2673_v22 = vsub.f32 %v256_v57, %v279_v18 }
 0x178   :  { %v304_v42 = vadd.f32 %v2349_v31, %v303_v37 }
 0x179   :  { %v284_v23 = vmul.f32 %v2667_v19, %v2667_v19  ;;  %v285_v24 = vmul.f32 %v2669_v20, %v2669_v20  ;;  %v286_v25 = vmul.f32 %v2671_v21, %v2671_v21  ;;  %v287_v27 = vmul.f32 %v2673_v22, %v2673_v22 }
 0x17a   :  { %v306_v45 = vsel %vm305_vm10, %v2349_v31, %v304_v42 }
 0x17b   :  { %v288_v26 = vadd.f32 %v285_v24, %v284_v23  ;;  %v2541_v23 = vmov 34  }
 0x17d   :  { %v289_v28 = vadd.f32 %v288_v26, %v286_v25 }
 0x17f   :  { %v290_v29 = vadd.f32 %v289_v28, %v287_v27 }
 0x181   :  { %291 = vadd.xlane.f32.xlu2 %v290_v29 }
 0x1f4   :  { %v292_v34 = vpop.xlane.xlu2 %291 }
 0x1f5   :  { %v293_v35 = vrot.slane %v292_v34, 4 }
 0x1f7   :  { %v294_v36 = vadd.f32 %v293_v35, %v292_v34 }
 0x1f9   :  { %v295_v38 = vrot.slane %v294_v36, 2 }
 0x1fb   :  { %v296_v41 = vadd.f32 %v295_v38, %v294_v36 }
 0x1fd   :  { %v297_v43 = vrot.slane %v296_v41, 1 }
 0x1ff   :  { %v298_v44 = vadd.f32 %v297_v43, %v296_v41 }
 0x201   :  { %2179 = vpush %v298_v44 }
 0x202   :  { %2181 = vpush %v306_v45 }
 0x232   :  { %s2180_s20 = spop %2179 }
 0x233   :  { %s2683_s21 = spop %2181 }
 0x234   :  { %s308_s22 = smul.f32 %s2683_s21, %s2180_s20 }
 0x236   :  { %v309_v49 = vstv %s308_s22 }
 0x237   :  { %2350 = vrsqrt.f32 %v309_v49  ;;  %vm316_vm12 = vweird.f32 %v309_v49 }
 0x23d   :  { %v2351_v52 = vpop.eup %2350 }
 0x23e   :  { %v311_v53 = vmul.f32 %v2351_v52, %v309_v49  ;;  %vm317_vm11 = vweird.f32 %v2351_v52 }
 0x23f   :  { %vm318_vm13 = vmor %vm316_vm12, %vm317_vm11 }
 0x240   :  { %v312_v54 = vmul.f32 %v2351_v52, %v311_v53 }
 0x242   :  { %v313_v57 = vmul.f32 0.5, %v312_v54 }
 0x244   :  { %v314_v58 = vsub.f32 1.5, %v313_v57 }
 0x246   :  { %v315_v60 = vmul.f32 %v2351_v52, %v314_v58 }
 0x248   :  { %v319_v61 = vsel %vm318_vm13, %v2351_v52, %v315_v60 }
 0x249   :  { %2183 = vpush %v319_v61 }
 0x24a   :  { %2185 = vpush %v380_v62 }
 0x27a   :  { %s2184_s23 = spop %2183 }
 0x27b   :  { %v2689_v0 = vstv %s2184_s23  ;;  %s2186_s24 = spop %2185 }
 0x27c   :  { %s390_s25 = smul.f32 %s2186_s24, %s2664_s18  ;;  %v325_v1 = vmul.f32 %v2689_v0, %v2630_v13  ;;  %v323_v24 = vmul.f32 %v2689_v0, %v2628_v12  ;;  %v322_v50 = vmul.f32 %v2689_v0, %v2616_v7 }
 0x27e   :  { %v391_v2 = vstv %s390_s25  ;;  %343 = vperm.xlu2 %2294, %v325_v1  }
 0x27f   :  { %v2695_v3 = vsub.f32 %v2652_v39, %v391_v2  ;;  %v2698_v4 = vsub.f32 %v2654_v40, %v391_v2  ;;  %v2701_v5 = vsub.f32 %v2656_v48, %v391_v2  ;;  %v2704_v6 = vsub.f32 %v2661_v56, %v391_v2 }
 0x280   :  { %v324_v40 = vmul.f32 %v2689_v0, %v2619_v10 }
 0x281   :  { %v396_v8 = vmul.f32 %v2695_v3, %v2695_v3  ;;  %v397_v9 = vmul.f32 %v2698_v4, %v2698_v4  ;;  %v398_v17 = vmul.f32 %v2701_v5, %v2701_v5  ;;  %v399_v48 = vmul.f32 %v2704_v6, %v2704_v6 }
 0x283   :  { %v400_v39 = vadd.f32 %v397_v9, %v396_v8 }
 0x285   :  { %v401_v18 = vadd.f32 %v400_v39, %v398_v17 }
 0x286   :  { %338 = vperm.xlu2 %2294, %v324_v40  }
 0x287   :  { %v402_v56 = vadd.f32 %v401_v18, %v399_v48 }
 0x289   :  { %403 = vadd.xlane.f32.xlu1 %v402_v56 }
 0x28e   :  { %2295 = vset.pattern.permute.xlu2 %v2541_v23 }
 0x28f   :  { %363 = vperm.xlu2 %2295, %v2630_v13  }
 0x297   :  { %2296 = vset.pattern.permute.xlu2 %v2540_v63 }
 0x2a2   :  { %333 = vperm.xlu1 %2298, %v323_v24  }
 0x2aa   :  { %2301 = vset.pattern.permute.xlu1 %v2541_v23 }
 0x2ab   :  { %355 = vperm.xlu1 %2301, %v2628_v12  }
 0x2b3   :  { %351 = vperm.xlu1 %2301, %v2616_v7  }
 0x2d8   :  { %v344_v51 = vpop.permute.xlu2 %343 }
 0x2d9   :  { %v349_v55 = vmul.f32 %v344_v51, %v2673_v22 }
 0x2fc   :  { %v404_v25 = vpop.xlane.xlu1 %403 }
 0x2fd   :  { %v405_v26 = vrot.slane %v404_v25, 4 }
 0x2ff   :  { %v406_v27 = vadd.f32 %v405_v26, %v404_v25 }
 0x301   :  { %v407_v28 = vrot.slane %v406_v27, 2 }
 0x303   :  { %v408_v29 = vadd.f32 %v407_v28, %v406_v27 }
 0x305   :  { %v409_v30 = vrot.slane %v408_v29, 1 }
 0x307   :  { %v410_v31 = vadd.f32 %v409_v30, %v408_v29 }
 0x309   :  { %2187 = vpush %v410_v31 }
 0x314   :  { %v334_v42 = vpop.permute.xlu1 %333 }
 0x315   :  { %v347_v47 = vmul.f32 %v334_v42, %v2669_v20  ;;  %v339_v20 = vpop.permute.xlu2 %338 }
 0x316   :  { %v348_v61 = vmul.f32 %v339_v20, %v2671_v21 }
 0x31d   :  { %v356_v46 = vpop.permute.xlu1 %355  ;;  %v364_v54 = vpop.permute.xlu2 %363 }
 0x31e   :  { %v2726_v49 = vadd.f32 %v356_v46, %v347_v47  ;;  %v2737_v57 = vadd.f32 %v364_v54, %v349_v55 }
 0x325   :  { %v352_v0 = vpop.permute.xlu1 %351 }
 0x33a   :  { %s2188_s28 = spop %2187 }
 0x33b   :  { %s420_s29 = smul.f32 %s2188_s28, %s2683_s21 }
 0x33d   :  { %v421_v32 = vstv %s420_s29 }
 0x33e   :  { %2352 = vrsqrt.f32 %v421_v32  ;;  %vm428_vm15 = vweird.f32 %v421_v32 }
 0x344   :  { %v2353_v33 = vpop.eup %2352 }
 0x345   :  { %v423_v34 = vmul.f32 %v2353_v33, %v421_v32  ;;  %vm429_vm14 = vweird.f32 %v2353_v33 }
 0x346   :  { %vm430_vm1 = vmor %vm428_vm15, %vm429_vm14 }
 0x347   :  { %v424_v35 = vmul.f32 %v2353_v33, %v423_v34 }
 0x349   :  { %v425_v36 = vmul.f32 0.5, %v424_v35 }
 0x34b   :  { %v426_v37 = vsub.f32 1.5, %v425_v36  ;;  %v2545_v36 = vmov 35  }
 0x34c   :  { %2302 = vset.pattern.permute.xlu1 %v2545_v36 }
 0x34d   :  { %v427_v38 = vmul.f32 %v2353_v33, %v426_v37 }
 0x34f   :  { %v431_v41 = vsel %vm430_vm1, %v2353_v33, %v427_v38 }
 0x350   :  { %2189 = vpush %v431_v41 }
 0x381   :  { %s2190_s30 = spop %2189 }
 0x382   :  { %v433_v43 = vstv %s2190_s30  ;;  %s2554_s30 = smov 126  }
 0x383   :  { %v436_v44 = vmul.f32 %v433_v43, %v2619_v10  ;;  %v437_v45 = vmul.f32 %v433_v43, %v2630_v13  ;;  %v435_v52 = vmul.f32 %v433_v43, %v2628_v12  ;;  %v434_v53 = vmul.f32 %v433_v43, %v2616_v7 }
 0x385   :  { %450 = vperm.xlu0 %2297, %v436_v44   ;;  %455 = vperm.xlu2 %2296, %v437_v45  }
 0x38d   :  { %2299 = vset.pattern.permute.xlu2 %v2541_v23  ;;  %507 = vrot.lane.b32.xlu0 %v2726_v49, %s2542_s2 }
 0x38e   :  { %359 = vperm.xlu2 %2299, %v2619_v10   ;;  %2304 = vset.pattern.permute.xlu0 %v2545_v36 }
 0x396   :  { %2300 = vset.pattern.permute.xlu2 %v2540_v63 }
 0x397   :  { %328 = vperm.xlu2 %2300, %v322_v50  }
 0x39f   :  { %445 = vperm.xlu2 %2300, %v435_v52  }
 0x3a7   :  { %440 = vperm.xlu2 %2300, %v434_v53  }
 0x3af   :  { %511 = vrot.lane.b32.xlu2 %v2737_v57, %s2542_s2 }
 0x3b0   :  { %2303 = vset.pattern.permute.xlu2 %v2545_v36 }
 0x3df   :  { %v456_v58 = vpop.permute.xlu2 %455 }
 0x3e0   :  { %v461_v59 = vmul.f32 %v456_v58, %v2704_v6 }
 0x3e2   :  { %v2742_v60 = vadd.f32 %v461_v59, %v364_v54 }
 0x3e4   :  { %519 = vrot.lane.b32.xlu0 %v2742_v60, %s2542_s2 }
 0x3e8   :  { %v360_v62 = vpop.permute.xlu2 %359 }
 0x3e9   :  { %v2747_v63 = vadd.f32 %v360_v62, %v348_v61 }
 0x3eb   :  { %509 = vrot.lane.b32.xlu1 %v2747_v63, %s2542_s2 }
 0x3f1   :  { %v329_v22 = vpop.permute.xlu2 %328 }
 0x3f2   :  { %v346_v1 = vmul.f32 %v329_v22, %v2667_v19 }
 0x3f4   :  { %v2752_v2 = vadd.f32 %v352_v0, %v346_v1 }
 0x3f6   :  { %505 = vrot.lane.b32.xlu2 %v2752_v2, %s2542_s2 }
 0x3f7   :  { %v451_v6 = vpop.permute.xlu0 %450 }
 0x3f8   :  { %v460_v8 = vmul.f32 %v451_v6, %v2701_v5 }
 0x3f9   :  { %v446_v9 = vpop.permute.xlu2 %445 }
 0x3fa   :  { %v459_v21 = vmul.f32 %v446_v9, %v2698_v4  ;;  %v464_v17 = vadd.f32 %v460_v8, %v360_v62 }
 0x3fc   :  { %v2758_v39 = vadd.f32 %v459_v21, %v356_v46  ;;  %v643_v21 = vstv %s2094_s8 }
 0x3fe   :  { %517 = vrot.lane.b32.xlu2 %v464_v17, %s2542_s2  ;;  %515 = vrot.lane.b32.xlu1 %v2758_v39, %s2542_s2 }
 0x3ff   :  { %v508_v56 = vpop.permute.xlu0 %507 }
 0x401   :  { %v441_v19 = vpop.permute.xlu2 %440 }
 0x402   :  { %v458_v40 = vmul.f32 %v441_v19, %v2695_v3  ;;  %v97_v3 = vlaneseq }
 0x404   :  { %v2764_v48 = vadd.f32 %v458_v40, %v352_v0  ;;  %v2779_v4 = vand.u32 127, %v97_v3 }
 0x406   :  { %468 = vrot.lane.b32.xlu2 %v2726_v49, %s2543_s6  ;;  %472 = vrot.lane.b32.xlu1 %v2737_v57, %s2543_s6  ;;  %v99_v18 = vadd.s32 128, %v2779_v4  ;;  %vm521_vm2 = vcmp.lt.s32.totalorder %v2779_v4, 127  ;;  %vm482_vm4 = vcmp.lt.s32.totalorder %v2779_v4, 1  ;;  %vm491_vm5 = vcmp.ge.s32.totalorder %v2779_v4, 1 }
 0x407   :  { %513 = vrot.lane.b32.xlu0 %v2764_v48, %s2542_s2  ;;  %s2555_s2 = smov 2  }
 0x408   :  { %v2782_v23 = vand.u32 127, %v99_v18 }
 0x409   :  { %v512_v5 = vpop.permute.xlu2 %511 }
 0x40a   :  { %vm531_vm3 = vcmp.lt.s32.totalorder %v2782_v23, 127  ;;  %vm492_vm6 = vcmp.ge.s32.totalorder %v2782_v23, 1 }
 0x40e   :  { %480 = vrot.lane.b32.xlu2 %v2742_v60, %s2543_s6  ;;  %478 = vrot.lane.b32.xlu1 %v464_v17, %s2543_s6 }
 0x40f   :  { %470 = vrot.lane.b32.xlu0 %v2747_v63, %s2543_s6 }
 0x416   :  { %466 = vrot.lane.b32.xlu1 %v2752_v2, %s2543_s6  ;;  %474 = vrot.lane.b32.xlu2 %v2764_v48, %s2543_s6 }
 0x417   :  { %476 = vrot.lane.b32.xlu0 %v2758_v39, %s2543_s6  ;;  %s2556_s6 = smov 112  }
 0x41e   :  { %562 = vrot.lane.b32.xlu1 %v2633_v14, %s2544_s7  ;;  %564 = vrot.lane.b32.xlu2 %v2640_v15, %s2544_s7 }
 0x41f   :  { %560 = vrot.lane.b32.xlu0 %v2621_v11, %s2544_s7 }
 0x426   :  { %545 = vperm.xlu1 %2302, %v2616_v7   ;;  %549 = vperm.xlu2 %2303, %v2628_v12  }
 0x427   :  { %566 = vrot.lane.b32.xlu0 %v2646_v16, %s2544_s7  ;;  %s2132_s7 = sld [smem:[#allocation2 + $0x3]] }
 0x42e   :  { %557 = vperm.xlu1 %2302, %v2630_v13  }
 0x42f   :  { %553 = vperm.xlu0 %2304, %v2619_v10  }
 0x450   :  { %v506_v24 = vpop.permute.xlu2 %505 }
 0x456   :  { %v520_v14 = vpop.permute.xlu0 %519 }
 0x457   :  { %v525_v11 = vsel %vm521_vm2, %v512_v5, %v520_v14  ;;  %v529_v15 = vsel %vm521_vm2, %v520_v14, %v512_v5 }
 0x458   :  { %2103 = vmatpush.msk.msra.mxu2 %vm521_vm2, %v525_v11  ;;  %2115 = vmatpush.msk.msra.mxu3 %vm531_vm3, %v529_v15  ;;  %v518_v16 = vpop.permute.xlu2 %517 }
 0x45d   :  { %v510_v25 = vpop.permute.xlu1 %509 }
 0x45e   :  { %v524_v26 = vsel %vm521_vm2, %v510_v25, %v518_v16  ;;  %v528_v27 = vsel %vm521_vm2, %v518_v16, %v510_v25 }
 0x45f   :  { %2104 = vmatpush.msk.msra.mxu2 %vm521_vm2, %v524_v26  ;;  %2116 = vmatpush.msk.msra.mxu3 %vm531_vm3, %v528_v27 }
 0x460   :  { %v469_v31 = vpop.permute.xlu2 %468 }
 0x468   :  { %v481_v38 = vpop.permute.xlu2 %480 }
 0x470   :  { %v516_v28 = vpop.permute.xlu1 %515  ;;  %v475_v51 = vpop.permute.xlu2 %474 }
 0x471   :  { %v523_v29 = vsel %vm521_vm2, %v508_v56, %v516_v28  ;;  %v527_v30 = vsel %vm521_vm2, %v516_v28, %v508_v56 }
 0x472   :  { %2105 = vmatpush.msk.msra.mxu2 %vm521_vm2, %v523_v29  ;;  %2117 = vmatpush.msk.msra.mxu3 %vm531_vm3, %v527_v30 }
 0x478   :  { %v473_v32 = vpop.permute.xlu1 %472  ;;  %v565_v55 = vpop.permute.xlu2 %564 }
 0x479   :  { %v514_v33 = vpop.permute.xlu0 %513  ;;  %v490_v42 = vsel %vm482_vm4, %v481_v38, %v473_v32  ;;  %v486_v43 = vsel %vm482_vm4, %v473_v32, %v481_v38 }
 0x47a   :  { %v522_v34 = vsel %vm521_vm2, %v506_v24, %v514_v33  ;;  %v526_v35 = vsel %vm521_vm2, %v514_v33, %v506_v24 }
 0x47b   :  { %2106 = vmatpush.msk.msra.mxu2 %vm521_vm2, %v522_v34  ;;  %2118 = vmatpush.msk.msra.mxu3 %vm531_vm3, %v526_v35 }
 0x47d   :  { %585 = vmatpush.msra.mxu2 %v2737_v57  ;;  %614 = vmatpush.msra.mxu3 %v2742_v60 }
 0x47f   :  { %586 = vmatpush.msra.mxu2 %v2747_v63  ;;  %615 = vmatpush.msra.mxu3 %v464_v17 }
 0x480   :  { %v479_v37 = vpop.permute.xlu1 %478  ;;  %v550_v62 = vpop.permute.xlu2 %549 }
 0x481   :  { %v471_v41 = vpop.permute.xlu0 %470  ;;  %587 = vmatpush.msra.mxu2 %v2726_v49  ;;  %616 = vmatpush.msra.mxu3 %v2758_v39 }
 0x482   :  { %v489_v44 = vsel %vm482_vm4, %v479_v37, %v471_v41  ;;  %v485_v45 = vsel %vm482_vm4, %v471_v41, %v479_v37 }
 0x483   :  { %588 = vmatpush.msra.mxu2 %v2752_v2  ;;  %617 = vmatpush.msra.mxu3 %v2764_v48 }
 0x485   :  { %2107 = vmatpush.msk.msra.mxu2 %vm491_vm5, %v490_v42  ;;  %2119 = vmatpush.msk.msra.mxu3 %vm492_vm6, %v486_v43 }
 0x487   :  { %2108 = vmatpush.msk.msra.mxu2 %vm491_vm5, %v489_v44  ;;  %2120 = vmatpush.msk.msra.mxu3 %vm492_vm6, %v485_v45 }
 0x488   :  { %v467_v46 = vpop.permute.xlu1 %466 }
 0x489   :  { %v477_v47 = vpop.permute.xlu0 %476  ;;  %v487_v52 = vsel %vm482_vm4, %v475_v51, %v467_v46  ;;  %v483_v20 = vsel %vm482_vm4, %v467_v46, %v475_v51 }
 0x48a   :  { %v488_v49 = vsel %vm482_vm4, %v477_v47, %v469_v31  ;;  %v484_v50 = vsel %vm482_vm4, %v469_v31, %v477_v47 }
 0x48b   :  { %2109 = vmatpush.msk.msra.mxu2 %vm491_vm5, %v488_v49  ;;  %2121 = vmatpush.msk.msra.mxu3 %vm492_vm6, %v484_v50 }
 0x48d   :  { %2110 = vmatpush.msk.msra.mxu2 %vm491_vm5, %v487_v52  ;;  %2122 = vmatpush.msk.msra.mxu3 %vm492_vm6, %v483_v20 }
 0x490   :  { %v563_v54 = vpop.permute.xlu1 %562 }
 0x491   :  { %v561_v53 = vpop.permute.xlu0 %560 }
 0x492   :  { %2111 = vmatmul.msk.f32.vlgmr.msra.gmra.mxu2 %vm568_vm7, %v561_v53  ;;  %2123 = vmatmul.msk.f32.vlgmr.msra.gmra.mxu3 %vm568_vm7, %v561_v53 }
 0x498   :  { %v546_v63 = vpop.permute.xlu1 %545 }
 0x499   :  { %v567_v57 = vpop.permute.xlu0 %566 }
 0x49a   :  { %2112 = vmatmul.msk.f32.gmra.mxu2 %vm568_vm7, %v563_v54  ;;  %2124 = vmatmul.msk.f32.gmra.mxu3 %vm568_vm7, %v563_v54 }
 0x4a0   :  { %v558_v14 = vpop.permute.xlu1 %557 }
 0x4a1   :  { %v554_v22 = vpop.permute.xlu0 %553 }
 0x4a2   :  { %2113 = vmatmul.msk.f32.gmra.mxu2 %vm568_vm7, %v565_v55  ;;  %2125 = vmatmul.msk.f32.gmra.mxu3 %vm568_vm7, %v565_v55 }
 0x4aa   :  { %2114 = vmatmul.msk.f32.gmra.mxu2 %vm568_vm7, %v567_v57  ;;  %2126 = vmatmul.msk.f32.gmra.mxu3 %vm568_vm7, %v567_v57  ;;  %vm944_vm7 = vcmask 130048  }
 0x515   :  { %v594_v58 = vpop.f32.mrf.mxu2  ;;  %v623_v59 = vpop.f32.mrf.mxu3 }
 0x516   :  { %v595_v2 = vadd.f32 %v594_v58, %v546_v63  ;;  %v624_v6 = vadd.f32 %v623_v59, %v546_v63 }
 0x518   :  { %v644_v48 = vmul.f32 %v643_v21, %v595_v2  ;;  %v645_v3 = vmul.f32 %v643_v21, %v624_v6  ;;  %vm635_vm10 = vcmp.ge.f32.partialorder %v595_v2, 0.0  ;;  %vm636_vm11 = vcmp.ge.f32.partialorder %v624_v6, 0.0 }
 0x51a   :  { %v652_v11 = vsel %vm635_vm10, %v595_v2, %v644_v48  ;;  %v2866_v15 = vsel %vm636_vm11, %v624_v6, %v645_v3 }
 0x51d   :  { %v597_v60 = vpop.f32.mrf.mxu2  ;;  %v626_v61 = vpop.f32.mrf.mxu3 }
 0x51e   :  { %v598_v0 = vadd.f32 %v597_v60, %v550_v62  ;;  %v627_v1 = vadd.f32 %v626_v61, %v550_v62 }
 0x520   :  { %v646_v19 = vmul.f32 %v643_v21, %v598_v0  ;;  %v647_v40 = vmul.f32 %v643_v21, %v627_v1  ;;  %vm637_vm8 = vcmp.ge.f32.partialorder %v598_v0, 0.0  ;;  %vm638_vm9 = vcmp.ge.f32.partialorder %v627_v1, 0.0 }
 0x522   :  { %v654_v56 = vsel %vm637_vm8, %v598_v0, %v646_v19  ;;  %v2864_v24 = vsel %vm638_vm9, %v627_v1, %v647_v40 }
 0x523   :  { %v660_v30 = vadd.f32 %v654_v56, %v652_v11  ;;  %v772_v31 = vadd.f32 %v2864_v24, %v2866_v15 }
 0x525   :  { %v600_v8 = vpop.f32.mrf.mxu2  ;;  %v629_v9 = vpop.f32.mrf.mxu3 }
 0x526   :  { %v601_v17 = vadd.f32 %v600_v8, %v554_v22  ;;  %v630_v39 = vadd.f32 %v629_v9, %v554_v22  ;;  %v2546_v8 = vmov 37  }
 0x527   :  { %2306 = vset.pattern.permute.xlu1 %v2546_v8  ;;  %2305 = vset.pattern.permute.xlu0 %v2546_v8 }
 0x528   :  { %v648_v5 = vmul.f32 %v643_v21, %v601_v17  ;;  %v649_v18 = vmul.f32 %v643_v21, %v630_v39  ;;  %vm639_vm12 = vcmp.ge.f32.partialorder %v601_v17, 0.0  ;;  %vm640_vm13 = vcmp.ge.f32.partialorder %v630_v39, 0.0 }
 0x52a   :  { %v656_v28 = vsel %vm639_vm12, %v601_v17, %v648_v5  ;;  %v2868_v29 = vsel %vm640_vm13, %v630_v39, %v649_v18 }
 0x52b   :  { %v661_v34 = vadd.f32 %v660_v30, %v656_v28  ;;  %v773_v35 = vadd.f32 %v772_v31, %v2868_v29 }
 0x52d   :  { %v603_v16 = vpop.f32.mrf.mxu2  ;;  %v632_v25 = vpop.f32.mrf.mxu3 }
 0x52e   :  { %v604_v26 = vadd.f32 %v603_v16, %v558_v14  ;;  %v633_v27 = vadd.f32 %v632_v25, %v558_v14 }
 0x530   :  { %v650_v32 = vmul.f32 %v643_v21, %v604_v26  ;;  %v651_v33 = vmul.f32 %v643_v21, %v633_v27  ;;  %vm641_vm14 = vcmp.ge.f32.partialorder %v604_v26, 0.0  ;;  %vm642_vm15 = vcmp.ge.f32.partialorder %v633_v27, 0.0 }
 0x532   :  { %v658_v36 = vsel %vm641_vm14, %v604_v26, %v650_v32  ;;  %v2873_v37 = vsel %vm642_vm15, %v633_v27, %v651_v33  ;;  %v2547_v26 = vmov 36  }
 0x533   :  { %v662_v38 = vadd.f32 %v661_v34, %v658_v36  ;;  %v774_v41 = vadd.f32 %v773_v35, %v2873_v37  ;;  %2307 = vset.pattern.permute.xlu2 %v2547_v26 }
 0x535   :  { %663 = vadd.xlane.f32.xlu2 %v662_v38  ;;  %775 = vadd.xlane.f32.xlu0 %v774_v41 }
 0x549   :  { %765 = vperm.xlu0 %2305, %v2630_v13  }
 0x5a8   :  { %v664_v42 = vpop.xlane.xlu2 %663  ;;  %v776_v9 = vpop.xlane.xlu0 %775 }
 0x5a9   :  { %v665_v43 = vrot.slane %v664_v42, 4  ;;  %v777_v21 = vrot.slane %v776_v9, 4 }
 0x5ab   :  { %v666_v44 = vadd.f32 %v665_v43, %v664_v42  ;;  %v778_v39 = vadd.f32 %v777_v21, %v776_v9 }
 0x5ad   :  { %v667_v45 = vrot.slane %v666_v44, 2  ;;  %v779_v19 = vrot.slane %v778_v39, 2 }
 0x5af   :  { %v668_v46 = vadd.f32 %v667_v45, %v666_v44  ;;  %v780_v5 = vadd.f32 %v779_v19, %v778_v39 }
 0x5b1   :  { %v669_v47 = vrot.slane %v668_v46, 1  ;;  %v781_v14 = vrot.slane %v780_v5, 1 }
 0x5b3   :  { %v670_v49 = vadd.f32 %v669_v47, %v668_v46  ;;  %v782_v25 = vadd.f32 %v781_v14, %v780_v5  ;;  %v2380_v14 = vld [vmem:[#allocation6 + $0x10] sm:$0xff] }
 0x5b5   :  { %2191 = vpush %v670_v49 }
 0x5bb   :  { %v2923_v43 = vpop.permute.xlu0 %765 }
 0x5e6   :  { %s2192_s9 = spop %2191 }
 0x5e7   :  { %s680_s0 = smul.f32 %s2192_s9, %s2664_s18 }
 0x5e9   :  { %v681_v50 = vstv %s680_s0 }
 0x5ea   :  { %v2877_v51 = vsub.f32 %v652_v11, %v681_v50  ;;  %v2879_v52 = vsub.f32 %v654_v56, %v681_v50  ;;  %v2881_v20 = vsub.f32 %v656_v28, %v681_v50  ;;  %v2883_v53 = vsub.f32 %v658_v36, %v681_v50 }
 0x5ec   :  { %v686_v54 = vmul.f32 %v2877_v51, %v2877_v51  ;;  %v687_v55 = vmul.f32 %v2879_v52, %v2879_v52  ;;  %v688_v57 = vmul.f32 %v2881_v20, %v2881_v20  ;;  %v689_v59 = vmul.f32 %v2883_v53, %v2883_v53 }
 0x5ee   :  { %v690_v58 = vadd.f32 %v687_v55, %v686_v54 }
 0x5f0   :  { %v691_v60 = vadd.f32 %v690_v58, %v688_v57 }
 0x5f2   :  { %v692_v61 = vadd.f32 %v691_v60, %v689_v59  ;;  %v2939_v60 = vld [vmem:[#allocation7 + $0x8] sm:$0xff] }
 0x5f4   :  { %693 = vadd.xlane.f32.xlu1 %v692_v61 }
 0x60d   :  { %761 = vperm.xlu1 %2306, %v2619_v10  }
 0x615   :  { %757 = vperm.xlu1 %2306, %v2628_v12  }
 0x61d   :  { %2308 = vset.pattern.permute.xlu1 %v2547_v26 }
 0x667   :  { %v694_v62 = vpop.xlane.xlu1 %693 }
 0x668   :  { %v695_v63 = vrot.slane %v694_v62, 4 }
 0x66a   :  { %v696_v22 = vadd.f32 %v695_v63, %v694_v62 }
 0x66c   :  { %v697_v0 = vrot.slane %v696_v22, 2 }
 0x66e   :  { %v698_v1 = vadd.f32 %v697_v0, %v696_v22 }
 0x670   :  { %v699_v2 = vrot.slane %v698_v1, 1 }
 0x672   :  { %v700_v6 = vadd.f32 %v699_v2, %v698_v1 }
 0x674   :  { %2193 = vpush %v700_v6 }
 0x67f   :  { %v2927_v45 = vpop.permute.xlu1 %761 }
 0x6a5   :  { %s2194_s10 = spop %2193 }
 0x6a6   :  { %s710_s11 = smul.f32 %s2194_s10, %s2683_s21 }
 0x6a8   :  { %v711_v17 = vstv %s710_s11 }
 0x6a9   :  { %2354 = vrsqrt.f32 %v711_v17  ;;  %vm718_vm2 = vweird.f32 %v711_v17 }
 0x6af   :  { %v2355_v40 = vpop.eup %2354 }
 0x6b0   :  { %v713_v48 = vmul.f32 %v2355_v40, %v711_v17  ;;  %vm719_vm1 = vweird.f32 %v2355_v40 }
 0x6b1   :  { %vm720_vm3 = vmor %vm718_vm2, %vm719_vm1 }
 0x6b2   :  { %v714_v3 = vmul.f32 %v2355_v40, %v713_v48 }
 0x6b4   :  { %v715_v18 = vmul.f32 0.5, %v714_v3 }
 0x6b6   :  { %v716_v56 = vsub.f32 1.5, %v715_v18 }
 0x6b8   :  { %v717_v11 = vmul.f32 %v2355_v40, %v716_v56 }
 0x6ba   :  { %v721_v16 = vsel %vm720_vm3, %v2355_v40, %v717_v11 }
 0x6bb   :  { %2195 = vpush %v721_v16  ;;  %v2381_v16 = vld [vmem:[#allocation6] sm:$0xff] }
 0x6bc   :  { %2197 = vpush %v782_v25 }
 0x6ec   :  { %s2196_s12 = spop %2195 }
 0x6ed   :  { %v723_v27 = vstv %s2196_s12  ;;  %s2198_s13 = spop %2197  ;;  %s2560_s12 = smov 64  }
 0x6ee   :  { %v727_v28 = vmul.f32 %v723_v27, %v2630_v13  ;;  %v726_v30 = vmul.f32 %v723_v27, %v2619_v10  ;;  %v725_v31 = vmul.f32 %v723_v27, %v2628_v12  ;;  %v724_v32 = vmul.f32 %v723_v27, %v2616_v7  ;;  %s792_s1 = smul.f32 %s2198_s13, %s2664_s18  ;;  %v2966_v27 = vld [vmem:[#allocation9 + $0x8] sm:$0xff] }
 0x6f0   :  { %745 = vperm.xlu2 %2307, %v727_v28   ;;  %740 = vperm.xlu1 %2308, %v726_v30   ;;  %v793_v33 = vstv %s792_s1  ;;  %v2549_v28 = vmov 80  }
 0x6f1   :  { %v2904_v34 = vsub.f32 %v2866_v15, %v793_v33  ;;  %v2907_v13 = vsub.f32 %v2864_v24, %v793_v33  ;;  %v2914_v35 = vsub.f32 %v2868_v29, %v793_v33  ;;  %v2917_v36 = vsub.f32 %v2873_v37, %v793_v33  ;;  %v2929_v37 = vpop.permute.xlu1 %757  ;;  %v2383_v33 = vld [vmem:[#allocation7 + $0x28] sm:$0xff] }
 0x6f3   :  { %v798_v10 = vmul.f32 %v2904_v34, %v2904_v34  ;;  %v799_v12 = vmul.f32 %v2907_v13, %v2907_v13  ;;  %v800_v15 = vmul.f32 %v2914_v35, %v2914_v35  ;;  %v801_v24 = vmul.f32 %v2917_v36, %v2917_v36 }
 0x6f8   :  { %2309 = vset.pattern.permute.xlu1 %v2546_v8  ;;  %735 = vperm.xlu2 %2307, %v725_v31   ;;  %v2382_v31 = vld [vmem:[#allocation7 + $0x38] sm:$0xff] }
 0x6f9   :  { %753 = vperm.xlu1 %2309, %v2616_v7   ;;  %v802_v7 = vadd.f32 %v799_v12, %v798_v10 }
 0x6fb   :  { %v803_v38 = vadd.f32 %v802_v7, %v800_v15 }
 0x6fd   :  { %v804_v41 = vadd.f32 %v803_v38, %v801_v24 }
 0x700   :  { %730 = vperm.xlu2 %2307, %v724_v32  }
 0x708   :  { %2314 = vset.pattern.permute.xlu2 %v2549_v28 }
 0x729   :  { %805 = vadd.xlane.f32.xlu2 %v804_v41 }
 0x74a   :  { %v746_v42 = vpop.permute.xlu2 %745 }
 0x74b   :  { %v751_v44 = vmul.f32 %v746_v42, %v2883_v53 }
 0x74d   :  { %v771_v29 = vadd.f32 %v2923_v43, %v751_v44 }
 0x74f   :  { %892 = vmatpush.msrb.mxu0 %v771_v29 }
 0x752   :  { %v736_v46 = vpop.permute.xlu2 %735 }
 0x753   :  { %v749_v49 = vmul.f32 %v736_v46, %v2879_v52  ;;  %v2943_v52 = vld [vmem:[#allocation7 + $0x18] sm:$0xff] }
 0x755   :  { %v769_v57 = vadd.f32 %v2929_v37, %v749_v49  ;;  %v2983_v49 = vstv %s2131_s17  ;;  %s2153_s17 = sld [smem:[#allocation2 + $0x4]] }
 0x75a   :  { %v731_v55 = vpop.permute.xlu2 %730 }
 0x75b   :  { %v748_v53 = vmul.f32 %v731_v55, %v2877_v51 }
 0x762   :  { %v741_v47 = vpop.permute.xlu1 %740 }
 0x763   :  { %v750_v50 = vmul.f32 %v741_v47, %v2881_v20  ;;  %v2548_v20 = vmov 38  }
 0x764   :  { %2310 = vset.pattern.permute.xlu0 %v2548_v20  ;;  %2311 = vset.pattern.permute.xlu1 %v2548_v20 }
 0x765   :  { %v770_v54 = vadd.f32 %v2927_v45, %v750_v50  ;;  %873 = vperm.xlu0 %2310, %v2943_v52   ;;  %869 = vperm.xlu1 %2311, %v2939_v60  }
 0x767   :  { %893 = vmatpush.msrb.mxu0 %v770_v54 }
 0x769   :  { %894 = vmatpush.msrb.mxu0 %v769_v57 }
 0x76b   :  { %v2936_v58 = vpop.permute.xlu1 %753 }
 0x76c   :  { %v768_v59 = vadd.f32 %v2936_v58, %v748_v53 }
 0x76d   :  { %2312 = vset.pattern.permute.xlu1 %v2547_v26  ;;  %2313 = vset.pattern.permute.xlu0 %v2547_v26  ;;  %v2961_v26 = vld [vmem:[#allocation9] sm:$0xff] }
 0x76e   :  { %895 = vmatpush.msrb.mxu0 %v768_v59  ;;  %936 = vperm.xlu2 %2314, %v2961_v26  }
 0x76f   :  { %2127 = vmatmul.msk.f32.vlgmr.msrb.gmra.mxu0 %vm162_vm0, %v2939_v60 }
 0x777   :  { %2128 = vmatmul.msk.f32.gmra.mxu0 %vm162_vm0, %v2943_v52 }
 0x79c   :  { %v806_v51 = vpop.xlane.xlu2 %805 }
 0x79d   :  { %v807_v61 = vrot.slane %v806_v51, 4 }
 0x79f   :  { %v808_v62 = vadd.f32 %v807_v61, %v806_v51 }
 0x7a1   :  { %v809_v63 = vrot.slane %v808_v62, 2 }
 0x7a3   :  { %v810_v22 = vadd.f32 %v809_v63, %v808_v62 }
 0x7a5   :  { %v811_v0 = vrot.slane %v810_v22, 1 }
 0x7a7   :  { %v812_v1 = vadd.f32 %v811_v0, %v810_v22 }
 0x7a9   :  { %2199 = vpush %v812_v1 }
 0x7c8   :  { %v2978_v44 = vpop.permute.xlu2 %936 }
 0x7d7   :  { %v2950_v3 = vpop.permute.xlu0 %873  ;;  %v2953_v18 = vpop.permute.xlu1 %869 }
 0x7da   :  { %s2200_s14 = spop %2199 }
 0x7db   :  { %s822_s15 = smul.f32 %s2200_s14, %s2683_s21 }
 0x7dd   :  { %v823_v2 = vstv %s822_s15 }
 0x7de   :  { %2356 = vrsqrt.f32 %v823_v2  ;;  %vm830_vm5 = vweird.f32 %v823_v2 }
 0x7e4   :  { %v2357_v6 = vpop.eup %2356 }
 0x7e5   :  { %v825_v8 = vmul.f32 %v2357_v6, %v823_v2  ;;  %vm831_vm4 = vweird.f32 %v2357_v6 }
 0x7e6   :  { %vm832_vm6 = vmor %vm830_vm5, %vm831_vm4  ;;  %vm1191_vm4 = vcmp.lt.s32.totalorder %v2779_v4, 126  ;;  %vm1197_vm5 = vcmp.lt.s32.totalorder %v2782_v23, 126 }
 0x7e7   :  { %v826_v9 = vmul.f32 %v2357_v6, %v825_v8 }
 0x7e9   :  { %v827_v21 = vmul.f32 0.5, %v826_v9 }
 0x7eb   :  { %v828_v17 = vsub.f32 1.5, %v827_v21 }
 0x7ec   :  { %v897_v39 = vpop.f32.mrf.mxu0 }
 0x7ed   :  { %v829_v19 = vmul.f32 %v2357_v6, %v828_v17  ;;  %v898_v56 = vadd.f32 %v897_v39, %v2953_v18 }
 0x7ef   :  { %v833_v40 = vsel %vm832_vm6, %v2357_v6, %v829_v19  ;;  %v2958_v25 = vadd.f32 %v2381_v16, %v898_v56  ;;  %vm1168_vm6 = vcmp.lt.s32.totalorder %v2779_v4, 2 }
 0x7f0   :  { %2201 = vpush %v833_v40  ;;  %v2384_v40 = vld [vmem:[#allocation6 + $0x18] sm:$0xff] }
 0x7f4   :  { %v900_v48 = vpop.f32.mrf.mxu0 }
 0x7f5   :  { %v901_v5 = vadd.f32 %v900_v48, %v2950_v3 }
 0x7f7   :  { %v2956_v11 = vadd.f32 %v2380_v14, %v901_v5  ;;  %v2385_v5 = vld [vmem:[#allocation6 + $0x8] sm:$0xff] }
 0x7f9   :  { %963 = vmatpush.msra.mxu0 %v2956_v11 }
 0x7fb   :  { %964 = vmatpush.msra.mxu0 %v2958_v25 }
 0x7fc   :  { %2133 = vmatmul.msk.f32.vlgmr.msra.gmra.mxu0 %vm944_vm7, %v2961_v26 }
 0x804   :  { %2134 = vmatmul.msk.f32.gmra.mxu0 %vm944_vm7, %v2966_v27 }
 0x821   :  { %s2202_s16 = spop %2201 }
 0x822   :  { %v835_v30 = vstv %s2202_s16 }
 0x823   :  { %v839_v32 = vmul.f32 %v2382_v31, %v835_v30  ;;  %v838_v10 = vmul.f32 %v2383_v33, %v835_v30  ;;  %v837_v12 = vmul.f32 %v2943_v52, %v835_v30  ;;  %v836_v7 = vmul.f32 %v2939_v60, %v835_v30 }
 0x825   :  { %857 = vperm.xlu1 %2312, %v839_v32   ;;  %852 = vperm.xlu0 %2313, %v838_v10  }
 0x82d   :  { %2315 = vset.pattern.permute.xlu0 %v2549_v28  ;;  %847 = vperm.xlu1 %2312, %v837_v12  }
 0x82e   :  { %941 = vperm.xlu0 %2315, %v2966_v27  }
 0x835   :  { %842 = vperm.xlu1 %2312, %v836_v7  }
 0x879   :  { %v966_v15 = vpop.f32.mrf.mxu0 }
 0x87a   :  { %v967_v46 = vadd.f32 %v966_v15, %v2978_v44 }
 0x87c   :  { %v1000_v55 = vmul.f32 %v2983_v49, %v967_v46  ;;  %vm995_vm8 = vcmp.ge.f32.partialorder %v967_v46, 0.0 }
 0x87e   :  { %v1004_v59 = vsel %vm995_vm8, %v967_v46, %v1000_v55  ;;  %vm1173_vm8 = vcmp.ge.s32.totalorder %v2779_v4, 2 }
 0x881   :  { %v969_v50 = vpop.f32.mrf.mxu0 }
 0x897   :  { %v858_v38 = vpop.permute.xlu1 %857  ;;  %v853_v24 = vpop.permute.xlu0 %852 }
 0x898   :  { %v863_v41 = vmul.f32 %v858_v38, %v2917_v36  ;;  %v862_v42 = vmul.f32 %v853_v24, %v2914_v35 }
 0x89a   :  { %v867_v29 = vadd.f32 %v863_v41, %v2923_v43  ;;  %v866_v47 = vadd.f32 %v862_v42, %v2927_v45  ;;  %v2551_v42 = vmov 2047.0  }
 0x89c   :  { %915 = vmatpush.msrb.mxu1 %v867_v29 }
 0x89e   :  { %916 = vmatpush.msrb.mxu1 %v866_v47 }
 0x89f   :  { %v848_v54 = vpop.permute.xlu1 %847 }
 0x8a0   :  { %v861_v36 = vmul.f32 %v848_v54, %v2907_v13  ;;  %v942_v57 = vpop.permute.xlu0 %941  ;;  %v2550_v13 = vmov 2048.0  }
 0x8a1   :  { %v970_v35 = vadd.f32 %v969_v50, %v942_v57  ;;  %2358 = vrcp.f32 %v2550_v13 }
 0x8a2   :  { %v865_v53 = vadd.f32 %v861_v36, %v2929_v37  ;;  %2360 = vrcp.f32 %v2551_v42 }
 0x8a3   :  { %v1002_v43 = vmul.f32 %v2983_v49, %v970_v35  ;;  %vm997_vm9 = vcmp.ge.f32.partialorder %v970_v35, 0.0 }
 0x8a4   :  { %917 = vmatpush.msrb.mxu1 %v865_v53 }
 0x8a5   :  { %v1006_v45 = vsel %vm997_vm9, %v970_v35, %v1002_v43  ;;  %vm1174_vm9 = vcmp.ge.s32.totalorder %v2782_v23, 2 }
 0x8a6   :  { %v1008_v20 = vadd.f32 %v1006_v45, %v1004_v59 }
 0x8a7   :  { %v843_v51 = vpop.permute.xlu1 %842  ;;  %v2359_v37 = vpop.eup %2358 }
 0x8a8   :  { %v860_v61 = vmul.f32 %v843_v51, %v2904_v34  ;;  %1009 = vadd.xlane.f32.xlu1 %v1008_v20  ;;  %v1019_v63 = vmul.f32 2048.0, %v2359_v37  ;;  %vm1023_vm10 = vweird.f32 %v2359_v37  ;;  %v2361_v29 = vpop.eup %2360 }
 0x8a9   :  { %v1043_v46 = vmul.f32 2047.0, %v2361_v29  ;;  %vm1047_vm12 = vweird.f32 %v2361_v29 }
 0x8aa   :  { %v864_v62 = vadd.f32 %v860_v61, %v2936_v58  ;;  %v1020_v22 = vsub.f32 1.0, %v1019_v63 }
 0x8ab   :  { %v1044_v47 = vsub.f32 1.0, %v1043_v46 }
 0x8ac   :  { %918 = vmatpush.msrb.mxu1 %v864_v62  ;;  %v1021_v6 = vmul.f32 %v2359_v37, %v1020_v22 }
 0x8ad   :  { %2129 = vmatmul.msk.f32.vlgmr.msrb.gmra.mxu1 %vm162_vm0, %v2939_v60  ;;  %v1045_v55 = vmul.f32 %v2361_v29, %v1044_v47 }
 0x8ae   :  { %v1022_v9 = vadd.f32 %v2359_v37, %v1021_v6 }
 0x8b0   :  { %v1024_v17 = vsel %vm1023_vm10, %v2359_v37, %v1022_v9  ;;  %vm1218_vm10 = vcmask 392192  }
 0x8b5   :  { %2130 = vmatmul.msk.f32.gmra.mxu1 %vm162_vm0, %v2943_v52 }
 0x91b   :  { %v1010_v0 = vpop.xlane.xlu1 %1009 }
 0x91c   :  { %v1011_v1 = vrot.slane %v1010_v0, 4 }
 0x91e   :  { %v1012_v2 = vadd.f32 %v1011_v1, %v1010_v0 }
 0x920   :  { %v1013_v34 = vrot.slane %v1012_v2, 2 }
 0x922   :  { %v1014_v8 = vadd.f32 %v1013_v34, %v1012_v2  ;;  %v2552_v2 = vmov 81  }
 0x923   :  { %2318 = vset.pattern.permute.xlu2 %v2552_v2  ;;  %2316 = vset.pattern.permute.xlu1 %v2552_v2 }
 0x924   :  { %v1015_v58 = vrot.slane %v1014_v8, 1  ;;  %2317 = vset.pattern.permute.xlu0 %v2552_v2 }
 0x926   :  { %v1016_v21 = vadd.f32 %v1015_v58, %v1014_v8 }
 0x928   :  { %2203 = vpush %v1016_v21  ;;  %v2553_v21 = vmov 82  }
 0x929   :  { %2205 = vpush %v1024_v17 }
 0x92a   :  { %v920_v60 = vpop.f32.mrf.mxu1 }
 0x92b   :  { %v921_v39 = vadd.f32 %v920_v60, %v2953_v18 }
 0x92d   :  { %v2999_v56 = vadd.f32 %v2385_v5, %v921_v39 }
 0x932   :  { %v923_v52 = vpop.f32.mrf.mxu1 }
 0x933   :  { %v924_v19 = vadd.f32 %v923_v52, %v2950_v3 }
 0x935   :  { %v2997_v48 = vadd.f32 %v2384_v40, %v924_v19 }
 0x937   :  { %986 = vmatpush.msra.mxu1 %v2997_v48 }
 0x939   :  { %987 = vmatpush.msra.mxu1 %v2999_v56 }
 0x93a   :  { %2135 = vmatmul.msk.f32.vlgmr.msra.gmra.mxu1 %vm944_vm7, %v2961_v26 }
 0x942   :  { %2136 = vmatmul.msk.f32.gmra.mxu1 %vm944_vm7, %v2966_v27 }
 0x959   :  { %s2204_s3 = spop %2203 }
 0x95a   :  { %s3007_s4 = spop %2205 }
 0x95b   :  { %s1026_s18 = smul.f32 %s3007_s4, %s2204_s3 }
 0x95d   :  { %v1027_v3 = vstv %s1026_s18 }
 0x95e   :  { %v3010_v18 = vsub.f32 %v1004_v59, %v1027_v3  ;;  %v3012_v14 = vsub.f32 %v1006_v45, %v1027_v3 }
 0x960   :  { %v1030_v16 = vmul.f32 %v3010_v18, %v3010_v18  ;;  %v1031_v30 = vmul.f32 %v3012_v14, %v3012_v14 }
 0x962   :  { %v1032_v31 = vadd.f32 %v1031_v30, %v1030_v16 }
 0x964   :  { %1033 = vadd.xlane.f32.xlu0 %v1032_v31 }
 0x9b7   :  { %v989_v32 = vpop.f32.mrf.mxu1 }
 0x9b8   :  { %v990_v33 = vadd.f32 %v989_v32, %v2978_v44 }
 0x9ba   :  { %v1001_v12 = vmul.f32 %v2983_v49, %v990_v33  ;;  %vm996_vm0 = vcmp.ge.f32.partialorder %v990_v33, 0.0 }
 0x9bc   :  { %v1005_v38 = vsel %vm996_vm0, %v990_v33, %v1001_v12 }
 0x9bf   :  { %v992_v10 = vpop.f32.mrf.mxu1 }
 0x9c0   :  { %v993_v7 = vadd.f32 %v992_v10, %v942_v57  ;;  %v1046_v57 = vadd.f32 %v2361_v29, %v1045_v55 }
 0x9c2   :  { %v1003_v15 = vmul.f32 %v2983_v49, %v993_v7  ;;  %vm998_vm11 = vcmp.ge.f32.partialorder %v993_v7, 0.0  ;;  %v1048_v43 = vsel %vm1047_vm12, %v2361_v29, %v1046_v57 }
 0x9c4   :  { %v1007_v24 = vsel %vm998_vm11, %v993_v7, %v1003_v15 }
 0x9c5   :  { %v1088_v41 = vadd.f32 %v1007_v24, %v1005_v38 }
 0x9c7   :  { %1089 = vadd.xlane.f32.xlu2 %v1088_v41 }
 0x9d7   :  { %v1034_v50 = vpop.xlane.xlu0 %1033 }
 0x9d8   :  { %v1035_v54 = vrot.slane %v1034_v50, 4 }
 0x9da   :  { %v1036_v44 = vadd.f32 %v1035_v54, %v1034_v50 }
 0x9dc   :  { %v1037_v36 = vrot.slane %v1036_v44, 2 }
 0x9de   :  { %v1038_v35 = vadd.f32 %v1037_v36, %v1036_v44 }
 0x9e0   :  { %v1039_v53 = vrot.slane %v1038_v35, 1 }
 0x9e2   :  { %v1040_v49 = vadd.f32 %v1039_v53, %v1038_v35 }
 0x9e4   :  { %2207 = vpush %v1040_v49 }
 0x9e5   :  { %2209 = vpush %v1048_v43 }
 0xa15   :  { %s2208_s19 = spop %2207 }
 0xa16   :  { %s3021_s20 = spop %2209 }
 0xa17   :  { %s1050_s21 = smul.f32 %s3021_s20, %s2208_s19 }
 0xa19   :  { %v1051_v59 = vstv %s1050_s21 }
 0xa1a   :  { %2362 = vrsqrt.f32 %v1051_v59  ;;  %vm1058_vm14 = vweird.f32 %v1051_v59 }
 0xa20   :  { %v2363_v45 = vpop.eup %2362 }
 0xa21   :  { %v1053_v20 = vmul.f32 %v2363_v45, %v1051_v59  ;;  %vm1059_vm13 = vweird.f32 %v2363_v45 }
 0xa22   :  { %vm1060_vm15 = vmor %vm1058_vm14, %vm1059_vm13 }
 0xa23   :  { %v1054_v51 = vmul.f32 %v2363_v45, %v1053_v20 }
 0xa25   :  { %v1055_v61 = vmul.f32 0.5, %v1054_v51 }
 0xa27   :  { %v1056_v62 = vsub.f32 1.5, %v1055_v61 }
 0xa29   :  { %v1057_v13 = vmul.f32 %v2363_v45, %v1056_v62 }
 0xa2b   :  { %v1061_v37 = vsel %vm1060_vm15, %v2363_v45, %v1057_v13 }
 0xa2c   :  { %2211 = vpush %v1061_v37  ;;  %v2557_v37 = vmov 83  }
 0xa3a   :  { %v1090_v63 = vpop.xlane.xlu2 %1089 }
 0xa3b   :  { %v1091_v22 = vrot.slane %v1090_v63, 4 }
 0xa3d   :  { %v1092_v0 = vadd.f32 %v1091_v22, %v1090_v63 }
 0xa3f   :  { %v1093_v1 = vrot.slane %v1092_v0, 2 }
 0xa41   :  { %v1094_v6 = vadd.f32 %v1093_v1, %v1092_v0 }
 0xa43   :  { %v1095_v34 = vrot.slane %v1094_v6, 1 }
 0xa45   :  { %v1096_v8 = vadd.f32 %v1095_v34, %v1094_v6 }
 0xa47   :  { %2213 = vpush %v1096_v8 }
 0xa5d   :  { %s2212_s22 = spop %2211 }
 0xa5e   :  { %v1063_v9 = vstv %s2212_s22 }
 0xa5f   :  { %v1064_v58 = vmul.f32 %v1063_v9, %v2961_v26  ;;  %v1065_v5 = vmul.f32 %v1063_v9, %v2966_v27 }
 0xa61   :  { %1068 = vperm.xlu2 %2318, %v1064_v58  }
 0xa69   :  { %2321 = vset.pattern.permute.xlu2 %v2553_v21 }
 0xa6a   :  { %1079 = vperm.xlu2 %2321, %v2961_v26  }
 0xa72   :  { %2322 = vset.pattern.permute.xlu2 %v2557_v37 }
 0xa78   :  { %s2214_s23 = spop %2213 }
 0xa79   :  { %s1106_s24 = smul.f32 %s2214_s23, %s3007_s4 }
 0xa7b   :  { %v1107_v17 = vstv %s1106_s24 }
 0xa7c   :  { %v1108_v60 = vsub.f32 %v1005_v38, %v1107_v17  ;;  %v1109_v52 = vsub.f32 %v1007_v24, %v1107_v17 }
 0xa7e   :  { %v1110_v39 = vmul.f32 %v1108_v60, %v1108_v60  ;;  %v1111_v19 = vmul.f32 %v1109_v52, %v1109_v52 }
 0xa80   :  { %v1112_v40 = vadd.f32 %v1111_v19, %v1110_v39 }
 0xa82   :  { %1113 = vadd.xlane.f32.xlu1 %v1112_v40 }
 0xa9b   :  { %1073 = vperm.xlu1 %2316, %v1065_v5  }
 0xaa3   :  { %2319 = vset.pattern.permute.xlu1 %v2553_v21 }
 0xaa4   :  { %1083 = vperm.xlu1 %2319, %v2966_v27  }
 0xaac   :  { %2320 = vset.pattern.permute.xlu1 %v2552_v2 }
 0xabb   :  { %v1069_v46 = vpop.permute.xlu2 %1068 }
 0xabc   :  { %v1076_v35 = vmul.f32 %v1069_v46, %v3010_v18 }
 0xac4   :  { %v1080_v55 = vpop.permute.xlu2 %1079 }
 0xac5   :  { %v1086_v53 = vadd.f32 %v1080_v55, %v1076_v35 }
 0xaf5   :  { %v1114_v3 = vpop.xlane.xlu1 %1113 }
 0xaf6   :  { %v1115_v16 = vrot.slane %v1114_v3, 4 }
 0xaf8   :  { %v1116_v30 = vadd.f32 %v1115_v16, %v1114_v3 }
 0xafa   :  { %v1117_v31 = vrot.slane %v1116_v30, 2 }
 0xafc   :  { %v1118_v32 = vadd.f32 %v1117_v31, %v1116_v30  ;;  %v1273_v31 = vstv %s2132_s7 }
 0xafe   :  { %v1119_v33 = vrot.slane %v1118_v32, 1 }
 0xb00   :  { %v1120_v10 = vadd.f32 %v1119_v33, %v1118_v32 }
 0xb02   :  { %2215 = vpush %v1120_v10 }
 0xb0d   :  { %v1074_v47 = vpop.permute.xlu1 %1073 }
 0xb0e   :  { %v1077_v57 = vmul.f32 %v1074_v47, %v3012_v14 }
 0xb16   :  { %v1084_v36 = vpop.permute.xlu1 %1083 }
 0xb17   :  { %v1087_v49 = vadd.f32 %v1084_v36, %v1077_v57 }
 0xb33   :  { %s2216_s25 = spop %2215 }
 0xb34   :  { %s1130_s28 = smul.f32 %s2216_s25, %s3021_s20 }
 0xb36   :  { %v1131_v12 = vstv %s1130_s28 }
 0xb37   :  { %2364 = vrsqrt.f32 %v1131_v12  ;;  %vm1138_vm2 = vweird.f32 %v1131_v12 }
 0xb3d   :  { %v2365_v7 = vpop.eup %2364 }
 0xb3e   :  { %v1133_v15 = vmul.f32 %v2365_v7, %v1131_v12  ;;  %vm1139_vm1 = vweird.f32 %v2365_v7 }
 0xb3f   :  { %vm1140_vm3 = vmor %vm1138_vm2, %vm1139_vm1 }
 0xb40   :  { %v1134_v38 = vmul.f32 %v2365_v7, %v1133_v15 }
 0xb42   :  { %v1135_v24 = vmul.f32 0.5, %v1134_v38 }
 0xb44   :  { %v1136_v41 = vsub.f32 1.5, %v1135_v24 }
 0xb46   :  { %v1137_v42 = vmul.f32 %v2365_v7, %v1136_v41 }
 0xb48   :  { %v1141_v29 = vsel %vm1140_vm3, %v2365_v7, %v1137_v42 }
 0xb49   :  { %2217 = vpush %v1141_v29 }
 0xb7a   :  { %s2218_s29 = spop %2217 }
 0xb7b   :  { %v1143_v50 = vstv %s2218_s29 }
 0xb7c   :  { %v1144_v54 = vmul.f32 %v1143_v50, %v2961_v26  ;;  %v1145_v44 = vmul.f32 %v1143_v50, %v2966_v27 }
 0xb7e   :  { %1153 = vperm.xlu0 %2317, %v1145_v44   ;;  %1148 = vperm.xlu1 %2320, %v1144_v54  }
 0xb86   :  { %1185 = vrot.lane.b32.xlu1 %v1087_v49, %s2554_s30  ;;  %1183 = vrot.lane.b32.xlu0 %v1086_v53, %s2554_s30 }
 0xb87   :  { %2323 = vset.pattern.permute.xlu0 %v2557_v37 }
 0xbf0   :  { %v1154_v43 = vpop.permute.xlu0 %1153  ;;  %v1149_v59 = vpop.permute.xlu1 %1148 }
 0xbf1   :  { %v1157_v45 = vmul.f32 %v1154_v43, %v1109_v52  ;;  %v1156_v20 = vmul.f32 %v1149_v59, %v1108_v60 }
 0xbf3   :  { %v1159_v51 = vadd.f32 %v1157_v45, %v1084_v36  ;;  %v1158_v61 = vadd.f32 %v1156_v20, %v1080_v55 }
 0xbf5   :  { %1189 = vrot.lane.b32.xlu2 %v1159_v51, %s2554_s30  ;;  %1166 = vrot.lane.b32.xlu0 %v1159_v51, %s2555_s2 }
 0xbf6   :  { %1187 = vrot.lane.b32.xlu1 %v1158_v61, %s2554_s30  ;;  %s2562_s30 = smov 124  }
 0xbf8   :  { %v1186_v18 = vpop.permute.xlu1 %1185  ;;  %v1184_v63 = vpop.permute.xlu0 %1183 }
 0xbfd   :  { %1162 = vrot.lane.b32.xlu2 %v1087_v49, %s2555_s2  ;;  %1214 = vrot.lane.b32.xlu0 %v2961_v26, %s2556_s6 }
 0xbfe   :  { %1160 = vrot.lane.b32.xlu1 %v1086_v53, %s2555_s2 }
 0xc05   :  { %1164 = vrot.lane.b32.xlu2 %v1158_v61, %s2555_s2  ;;  %1211 = vperm.xlu0 %2323, %v2966_v27   ;;  %s2563_s2 = smov 4  }
 0xc06   :  { %1216 = vrot.lane.b32.xlu1 %v2966_v27, %s2556_s6 }
 0xc0d   :  { %1207 = vperm.xlu2 %2322, %v2961_v26  }
 0xc4f   :  { %v1190_v14 = vpop.permute.xlu2 %1189 }
 0xc50   :  { %v1193_v62 = vsel %vm1191_vm4, %v1186_v18, %v1190_v14  ;;  %v1195_v13 = vsel %vm1191_vm4, %v1190_v14, %v1186_v18 }
 0xc51   :  { %2137 = vmatpush.msk.msrb.mxu2 %vm1191_vm4, %v1193_v62  ;;  %2143 = vmatpush.msk.msrb.mxu3 %vm1197_vm5, %v1195_v13 }
 0xc57   :  { %v1163_v22 = vpop.permute.xlu2 %1162 }
 0xc5f   :  { %v1165_v8 = vpop.permute.xlu2 %1164 }
 0xc67   :  { %v1167_v0 = vpop.permute.xlu0 %1166  ;;  %v1208_v3 = vpop.permute.xlu2 %1207 }
 0xc68   :  { %v1188_v1 = vpop.permute.xlu1 %1187  ;;  %v1172_v9 = vsel %vm1168_vm6, %v1167_v0, %v1163_v22  ;;  %v1170_v58 = vsel %vm1168_vm6, %v1163_v22, %v1167_v0 }
 0xc69   :  { %v1192_v6 = vsel %vm1191_vm4, %v1184_v63, %v1188_v1  ;;  %v1194_v34 = vsel %vm1191_vm4, %v1188_v1, %v1184_v63  ;;  %v2558_v1 = vmov 85  }
 0xc6a   :  { %2138 = vmatpush.msk.msrb.mxu2 %vm1191_vm4, %v1192_v6  ;;  %2144 = vmatpush.msk.msrb.mxu3 %vm1197_vm5, %v1194_v34 }
 0xc6b   :  { %2325 = vset.pattern.permute.xlu1 %v2558_v1  ;;  %2324 = vset.pattern.permute.xlu0 %v2558_v1 }
 0xc6c   :  { %1235 = vmatpush.msrb.mxu2 %v1087_v49  ;;  %1258 = vmatpush.msrb.mxu3 %v1159_v51 }
 0xc6e   :  { %1236 = vmatpush.msrb.mxu2 %v1086_v53  ;;  %1259 = vmatpush.msrb.mxu3 %v1158_v61 }
 0xc6f   :  { %v1215_v60 = vpop.permute.xlu0 %1214 }
 0xc70   :  { %v1161_v17 = vpop.permute.xlu1 %1160  ;;  %2139 = vmatpush.msk.msrb.mxu2 %vm1173_vm8, %v1172_v9  ;;  %2145 = vmatpush.msk.msrb.mxu3 %vm1174_vm9, %v1170_v58 }
 0xc71   :  { %v1171_v52 = vsel %vm1168_vm6, %v1165_v8, %v1161_v17  ;;  %v1169_v39 = vsel %vm1168_vm6, %v1161_v17, %v1165_v8 }
 0xc72   :  { %2140 = vmatpush.msk.msrb.mxu2 %vm1173_vm8, %v1171_v52  ;;  %2146 = vmatpush.msk.msrb.mxu3 %vm1174_vm9, %v1169_v39 }
 0xc73   :  { %2141 = vmatmul.msk.f32.vlgmr.msrb.gmra.mxu2 %vm1218_vm10, %v1215_v60  ;;  %2147 = vmatmul.msk.f32.vlgmr.msrb.gmra.mxu3 %vm1218_vm10, %v1215_v60 }
 0xc77   :  { %v1212_v32 = vpop.permute.xlu0 %1211 }
 0xc78   :  { %v1217_v19 = vpop.permute.xlu1 %1216 }
 0xc7b   :  { %2142 = vmatmul.msk.f32.gmra.mxu2 %vm1218_vm10, %v1217_v19  ;;  %2148 = vmatmul.msk.f32.gmra.mxu3 %vm1218_vm10, %v1217_v19 }
 0xcf6   :  { %v1240_v40 = vpop.f32.mrf.mxu2  ;;  %v1263_v5 = vpop.f32.mrf.mxu3 }
 0xcf7   :  { %v1241_v16 = vadd.f32 %v1240_v40, %v1208_v3  ;;  %v1264_v30 = vadd.f32 %v1263_v5, %v1208_v3 }
 0xcf9   :  { %v1274_v12 = vmul.f32 %v1273_v31, %v1241_v16  ;;  %v1275_v7 = vmul.f32 %v1273_v31, %v1264_v30  ;;  %vm1270_vm0 = vcmp.ge.f32.partialorder %v1264_v30, 0.0  ;;  %vm1269_vm11 = vcmp.ge.f32.partialorder %v1241_v16, 0.0 }
 0xcfb   :  { %v3073_v42 = vsel %vm1270_vm0, %v1264_v30, %v1275_v7  ;;  %v1278_v46 = vsel %vm1269_vm11, %v1241_v16, %v1274_v12 }
 0xcfe   :  { %v1243_v33 = vpop.f32.mrf.mxu2  ;;  %v1266_v10 = vpop.f32.mrf.mxu3 }
 0xcff   :  { %v1244_v15 = vadd.f32 %v1243_v33, %v1212_v32  ;;  %v1267_v38 = vadd.f32 %v1266_v10, %v1212_v32 }
 0xd01   :  { %v1276_v24 = vmul.f32 %v1273_v31, %v1244_v15  ;;  %v1277_v41 = vmul.f32 %v1273_v31, %v1267_v38  ;;  %vm1272_vm12 = vcmp.ge.f32.partialorder %v1267_v38, 0.0  ;;  %vm1271_vm13 = vcmp.ge.f32.partialorder %v1244_v15, 0.0 }
 0xd02   :  { %v2559_v31 = vmov 84  }
 0xd03   :  { %v3075_v29 = vsel %vm1272_vm12, %v1267_v38, %v1277_v41  ;;  %v1280_v47 = vsel %vm1271_vm13, %v1244_v15, %v1276_v24  ;;  %2327 = vset.pattern.permute.xlu2 %v2559_v31 }
 0xd04   :  { %v1362_v50 = vadd.f32 %v3075_v29, %v3073_v42  ;;  %v1282_v54 = vadd.f32 %v1280_v47, %v1278_v46 }
 0xd06   :  { %1363 = vadd.xlane.f32.xlu0 %v1362_v50  ;;  %1283 = vadd.xlane.f32.xlu1 %v1282_v54 }
 0xd1a   :  { %1357 = vperm.xlu0 %2324, %v2966_v27  }
 0xd1f   :  { %1353 = vperm.xlu1 %2325, %v2961_v26  }
 0xd27   :  { %2326 = vset.pattern.permute.xlu1 %v2559_v31 }
 0xd79   :  { %v1284_v44 = vpop.xlane.xlu1 %1283  ;;  %v1364_v6 = vpop.xlane.xlu0 %1363 }
 0xd7a   :  { %v1285_v55 = vrot.slane %v1284_v44, 4  ;;  %v1365_v34 = vrot.slane %v1364_v6, 4 }
 0xd7c   :  { %v1286_v36 = vadd.f32 %v1285_v55, %v1284_v44  ;;  %v1366_v9 = vadd.f32 %v1365_v34, %v1364_v6 }
 0xd7e   :  { %v1287_v35 = vrot.slane %v1286_v36, 2  ;;  %v1367_v58 = vrot.slane %v1366_v9, 2 }
 0xd80   :  { %v1288_v57 = vadd.f32 %v1287_v35, %v1286_v36  ;;  %v1368_v39 = vadd.f32 %v1367_v58, %v1366_v9 }
 0xd82   :  { %v1289_v53 = vrot.slane %v1288_v57, 1  ;;  %v1369_v5 = vrot.slane %v1368_v39, 1 }
 0xd84   :  { %v1290_v49 = vadd.f32 %v1289_v53, %v1288_v57  ;;  %v1370_v30 = vadd.f32 %v1369_v5, %v1368_v39 }
 0xd86   :  { %2219 = vpush %v1290_v49 }
 0xd8c   :  { %v3121_v50 = vpop.permute.xlu0 %1357 }
 0xdb7   :  { %s2220_s8 = spop %2219 }
 0xdb8   :  { %s1300_s9 = smul.f32 %s2220_s8, %s3007_s4 }
 0xdba   :  { %v1301_v43 = vstv %s1300_s9 }
 0xdbb   :  { %v3080_v59 = vsub.f32 %v1278_v46, %v1301_v43  ;;  %v3082_v45 = vsub.f32 %v1280_v47, %v1301_v43  ;;  %v2561_v46 = vmov 86  }
 0xdbc   :  { %2329 = vset.pattern.permute.xlu0 %v2561_v46 }
 0xdbd   :  { %v1304_v20 = vmul.f32 %v3080_v59, %v3080_v59  ;;  %v1305_v51 = vmul.f32 %v3082_v45, %v3082_v45  ;;  %1435 = vperm.xlu0 %2329, %v2961_v26  }
 0xdbf   :  { %v1306_v61 = vadd.f32 %v1305_v51, %v1304_v20 }
 0xdc1   :  { %1307 = vadd.xlane.f32.xlu2 %v1306_v61 }
 0xdc5   :  { %2332 = vset.pattern.permute.xlu0 %v2549_v28 }
 0xe34   :  { %v1308_v18 = vpop.xlane.xlu2 %1307 }
 0xe35   :  { %v1309_v14 = vrot.slane %v1308_v18, 4 }
 0xe37   :  { %v1310_v62 = vadd.f32 %v1309_v14, %v1308_v18 }
 0xe39   :  { %v1311_v13 = vrot.slane %v1310_v62, 2 }
 0xe3b   :  { %v1312_v63 = vadd.f32 %v1311_v13, %v1310_v62  ;;  %v3136_v62 = vld [vmem:[#allocation10] sm:$0xff]  ;;  %v3138_v13 = vld [vmem:[#allocation10 + $0x8] sm:$0xff] }
 0xe3c   :  { %1511 = vperm.xlu0 %2332, %v3138_v13  }
 0xe3d   :  { %v1313_v22 = vrot.slane %v1312_v63, 1 }
 0xe3f   :  { %v1314_v0 = vadd.f32 %v1313_v22, %v1312_v63 }
 0xe41   :  { %2221 = vpush %v1314_v0 }
 0xe44   :  { %2334 = vset.pattern.permute.xlu0 %v2552_v2 }
 0xe72   :  { %s2222_s0 = spop %2221 }
 0xe73   :  { %s1324_s10 = smul.f32 %s2222_s0, %s3021_s20 }
 0xe75   :  { %v1325_v8 = vstv %s1324_s10 }
 0xe76   :  { %2366 = vrsqrt.f32 %v1325_v8  ;;  %vm1332_vm15 = vweird.f32 %v1325_v8 }
 0xe7c   :  { %v2367_v17 = vpop.eup %2366 }
 0xe7d   :  { %v1327_v60 = vmul.f32 %v2367_v17, %v1325_v8  ;;  %vm1333_vm14 = vweird.f32 %v2367_v17  ;;  %v1436_v8 = vpop.permute.xlu0 %1435 }
 0xe7e   :  { %vm1334_vm1 = vmor %vm1332_vm15, %vm1333_vm14 }
 0xe7f   :  { %v1328_v52 = vmul.f32 %v2367_v17, %v1327_v60 }
 0xe81   :  { %v1329_v19 = vmul.f32 0.5, %v1328_v52 }
 0xe83   :  { %v1330_v40 = vsub.f32 1.5, %v1329_v19 }
 0xe85   :  { %v1331_v3 = vmul.f32 %v2367_v17, %v1330_v40 }
 0xe87   :  { %v1335_v16 = vsel %vm1334_vm1, %v2367_v17, %v1331_v3  ;;  %vm1766_vm1 = vcmp.lt.s32.totalorder %v2782_v23, 124 }
 0xe88   :  { %2223 = vpush %v1335_v16  ;;  %v1568_v16 = vstv %s2153_s17  ;;  %s2078_s17 = sshll.u32 %s3272_s5, 4  ;;  %s2079_s17 = int_to_ptr.hbm [resolvable:$true] %s2078_s17 }
 0xe89   :  { %2225 = vpush %v1370_v30 }
 0xeae   :  { %v1512_v30 = vpop.permute.xlu0 %1511 }
 0xeb9   :  { %s2224_s11 = spop %2223 }
 0xeba   :  { %v1337_v32 = vstv %s2224_s11  ;;  %s2226_s13 = spop %2225 }
 0xebb   :  { %v1338_v33 = vmul.f32 %v1337_v32, %v2961_v26  ;;  %v1339_v10 = vmul.f32 %v1337_v32, %v2966_v27  ;;  %s1380_s1 = smul.f32 %s2226_s13, %s3007_s4 }
 0xebd   :  { %1347 = vperm.xlu1 %2326, %v1339_v10   ;;  %1342 = vperm.xlu2 %2327, %v1338_v33   ;;  %v1381_v12 = vstv %s1380_s1 }
 0xebe   :  { %v3104_v7 = vsub.f32 %v3073_v42, %v1381_v12  ;;  %v3107_v15 = vsub.f32 %v3075_v29, %v1381_v12  ;;  %v3117_v42 = vpop.permute.xlu1 %1353 }
 0xec0   :  { %v1384_v38 = vmul.f32 %v3104_v7, %v3104_v7  ;;  %v1385_v24 = vmul.f32 %v3107_v15, %v3107_v15 }
 0xec2   :  { %v1386_v41 = vadd.f32 %v1385_v24, %v1384_v38 }
 0xec5   :  { %1442 = vrot.lane.b32.xlu1 %v2961_v26, %s2560_s12  ;;  %2331 = vset.pattern.permute.xlu2 %v2549_v28 }
 0xec6   :  { %2328 = vset.pattern.permute.xlu1 %v2561_v46 }
 0xecd   :  { %1444 = vrot.lane.b32.xlu1 %v2966_v27, %s2560_s12 }
 0xed5   :  { %1439 = vperm.xlu1 %2328, %v2966_v27  }
 0xedd   :  { %2330 = vset.pattern.permute.xlu1 %v2559_v31 }
 0xee6   :  { %1387 = vadd.xlane.f32.xlu2 %v1386_v41 }
 0xefe   :  { %1506 = vperm.xlu2 %2331, %v3136_v62  }
 0xf06   :  { %2335 = vset.pattern.permute.xlu2 %v2552_v2 }
 0xf17   :  { %v1343_v29 = vpop.permute.xlu2 %1342 }
 0xf18   :  { %v1350_v54 = vmul.f32 %v1343_v29, %v3080_v59 }
 0xf1a   :  { %v1360_v36 = vadd.f32 %v3117_v42, %v1350_v54 }
 0xf2f   :  { %v1348_v47 = vpop.permute.xlu1 %1347 }
 0xf30   :  { %v1351_v44 = vmul.f32 %v1348_v47, %v3082_v45 }
 0xf32   :  { %v1361_v55 = vadd.f32 %v3121_v50, %v1351_v44 }
 0xf34   :  { %1464 = vmatpush.msrb.mxu0 %v1361_v55 }
 0xf36   :  { %1465 = vmatpush.msrb.mxu0 %v1360_v36 }
 0xf37   :  { %v3127_v35 = vpop.permute.xlu1 %1442 }
 0xf38   :  { %2149 = vmatmul.msk.f32.vlgmr.msrb.gmra.mxu0 %vm944_vm7, %v3127_v35 }
 0xf3f   :  { %v3131_v28 = vpop.permute.xlu1 %1444 }
 0xf40   :  { %2150 = vmatmul.msk.f32.gmra.mxu0 %vm944_vm7, %v3131_v28 }
 0xf47   :  { %v1440_v9 = vpop.permute.xlu1 %1439 }
 0xf59   :  { %v1388_v57 = vpop.xlane.xlu2 %1387 }
 0xf5a   :  { %v1389_v53 = vrot.slane %v1388_v57, 4 }
 0xf5c   :  { %v1390_v49 = vadd.f32 %v1389_v53, %v1388_v57 }
 0xf5e   :  { %v1391_v43 = vrot.slane %v1390_v49, 2 }
 0xf60   :  { %v1392_v59 = vadd.f32 %v1391_v43, %v1390_v49 }
 0xf61   :  { %v1507_v5 = vpop.permute.xlu2 %1506 }
 0xf62   :  { %v1393_v45 = vrot.slane %v1392_v59, 1 }
 0xf64   :  { %v1394_v20 = vadd.f32 %v1393_v45, %v1392_v59 }
 0xf66   :  { %2227 = vpush %v1394_v20 }
 0xf97   :  { %s2228_s14 = spop %2227 }
 0xf98   :  { %s1404_s15 = smul.f32 %s2228_s14, %s3021_s20 }
 0xf9a   :  { %v1405_v51 = vstv %s1404_s15 }
 0xf9b   :  { %2368 = vrsqrt.f32 %v1405_v51  ;;  %vm1412_vm3 = vweird.f32 %v1405_v51 }
 0xfa1   :  { %v2369_v61 = vpop.eup %2368 }
 0xfa2   :  { %v1407_v18 = vmul.f32 %v2369_v61, %v1405_v51  ;;  %vm1413_vm2 = vweird.f32 %v2369_v61 }
 0xfa3   :  { %vm1414_vm4 = vmor %vm1412_vm3, %vm1413_vm2  ;;  %vm1760_vm2 = vcmp.lt.s32.totalorder %v2779_v4, 124  ;;  %vm1737_vm3 = vcmp.lt.s32.totalorder %v2779_v4, 4 }
 0xfa4   :  { %v1408_v14 = vmul.f32 %v2369_v61, %v1407_v18 }
 0xfa6   :  { %v1409_v63 = vmul.f32 0.5, %v1408_v14 }
 0xfa8   :  { %v1410_v22 = vsub.f32 1.5, %v1409_v63 }
 0xfaa   :  { %v1411_v0 = vmul.f32 %v2369_v61, %v1410_v22 }
 0xfac   :  { %v1415_v6 = vsel %vm1414_vm4, %v2369_v61, %v1411_v0  ;;  %vm1742_vm4 = vcmp.ge.s32.totalorder %v2779_v4, 4 }
 0xfad   :  { %2229 = vpush %v1415_v6 }
 0xfb5   :  { %v1467_v34 = vpop.f32.mrf.mxu0 }
 0xfb6   :  { %v1468_v17 = vadd.f32 %v1467_v34, %v1436_v8 }
 0xfb8   :  { %v3148_v39 = vadd.f32 %v1468_v17, %v2958_v25 }
 0xfbd   :  { %v1470_v58 = vpop.f32.mrf.mxu0 }
 0xfbe   :  { %v1471_v60 = vadd.f32 %v1470_v58, %v1440_v9 }
 0xfc0   :  { %v3145_v52 = vadd.f32 %v1471_v60, %v2956_v11 }
 0xfc2   :  { %1532 = vmatpush.msra.mxu2 %v3145_v52 }
 0xfc4   :  { %1533 = vmatpush.msra.mxu2 %v3148_v39 }
 0xfc5   :  { %2155 = vmatmul.msk.f32.vlgmr.msra.gmra.mxu2 %vm944_vm7, %v3136_v62 }
 0xfcd   :  { %2156 = vmatmul.msk.f32.gmra.mxu2 %vm944_vm7, %v3138_v13 }
 0xfde   :  { %s2230_s16 = spop %2229 }
 0xfdf   :  { %v1417_v19 = vstv %s2230_s16 }
 0xfe0   :  { %v1419_v40 = vmul.f32 %v1417_v19, %v2966_v27  ;;  %v1418_v11 = vmul.f32 %v1417_v19, %v2961_v26 }
 0xfe2   :  { %1427 = vperm.xlu1 %2330, %v1419_v40  }
 0xfea   :  { %1422 = vperm.xlu1 %2330, %v1418_v11  }
 0xff2   :  { %2333 = vset.pattern.permute.xlu1 %v2552_v2 }
0x1048   :  { %v1535_v25 = vpop.f32.mrf.mxu2 }
0x1049   :  { %v1536_v3 = vadd.f32 %v1535_v25, %v1507_v5 }
0x104b   :  { %v1569_v32 = vmul.f32 %v1568_v16, %v1536_v3  ;;  %vm1564_vm5 = vcmp.ge.f32.partialorder %v1536_v3, 0.0 }
0x104d   :  { %v1573_v38 = vsel %vm1564_vm5, %v1536_v3, %v1569_v32  ;;  %vm1743_vm5 = vcmp.ge.s32.totalorder %v2782_v23, 4 }
0x1050   :  { %v1538_v33 = vpop.f32.mrf.mxu2 }
0x1051   :  { %v1539_v10 = vadd.f32 %v1538_v33, %v1512_v30 }
0x1053   :  { %v1571_v12 = vmul.f32 %v1568_v16, %v1539_v10  ;;  %vm1566_vm6 = vcmp.ge.f32.partialorder %v1539_v10, 0.0 }
0x1054   :  { %v1428_v27 = vpop.permute.xlu1 %1427 }
0x1055   :  { %v1431_v24 = vmul.f32 %v1428_v27, %v3107_v15  ;;  %v1575_v26 = vsel %vm1566_vm6, %v1539_v10, %v1571_v12 }
0x1056   :  { %v1577_v41 = vadd.f32 %v1575_v26, %v1573_v38 }
0x1057   :  { %v1433_v2 = vadd.f32 %v1431_v24, %v3121_v50 }
0x1058   :  { %1578 = vadd.xlane.f32.xlu1 %v1577_v41 }
0x1059   :  { %1487 = vmatpush.msrb.mxu1 %v1433_v2 }
0x105c   :  { %v1423_v29 = vpop.permute.xlu1 %1422 }
0x105d   :  { %v1430_v47 = vmul.f32 %v1423_v29, %v3104_v7 }
0x105f   :  { %v1432_v54 = vadd.f32 %v1430_v47, %v3117_v42 }
0x1061   :  { %1488 = vmatpush.msrb.mxu1 %v1432_v54 }
0x1062   :  { %2151 = vmatmul.msk.f32.vlgmr.msrb.gmra.mxu1 %vm944_vm7, %v3127_v35 }
0x106a   :  { %2152 = vmatmul.msk.f32.gmra.mxu1 %vm944_vm7, %v3131_v28 }
0x10cb   :  { %v1579_v44 = vpop.xlane.xlu1 %1578 }
0x10cc   :  { %v1580_v15 = vrot.slane %v1579_v44, 4 }
0x10ce   :  { %v1581_v55 = vadd.f32 %v1580_v15, %v1579_v44 }
0x10d0   :  { %v1582_v36 = vrot.slane %v1581_v55, 2 }
0x10d2   :  { %v1583_v50 = vadd.f32 %v1582_v36, %v1581_v55 }
0x10d4   :  { %v1584_v57 = vrot.slane %v1583_v50, 1 }
0x10d6   :  { %v1585_v53 = vadd.f32 %v1584_v57, %v1583_v50 }
0x10d8   :  { %2231 = vpush %v1585_v53 }
0x10df   :  { %v1490_v49 = vpop.f32.mrf.mxu1 }
0x10e0   :  { %v1491_v43 = vadd.f32 %v1490_v49, %v1436_v8 }
0x10e2   :  { %v3171_v35 = vadd.f32 %v1491_v43, %v2999_v56 }
0x10e7   :  { %v1493_v7 = vpop.f32.mrf.mxu1 }
0x10e8   :  { %v1494_v42 = vadd.f32 %v1493_v7, %v1440_v9 }
0x10ea   :  { %v3168_v59 = vadd.f32 %v1494_v42, %v2997_v48 }
0x10ec   :  { %1555 = vmatpush.msra.mxu3 %v3168_v59 }
0x10ee   :  { %1556 = vmatpush.msra.mxu3 %v3171_v35 }
0x10ef   :  { %2157 = vmatmul.msk.f32.vlgmr.msra.gmra.mxu3 %vm944_vm7, %v3136_v62 }
0x10f7   :  { %2158 = vmatmul.msk.f32.gmra.mxu3 %vm944_vm7, %v3138_v13 }
0x1109   :  { %s2232_s3 = spop %2231 }
0x110a   :  { %s1595_s18 = smul.f32 %s2232_s3, %s3007_s4 }
0x110c   :  { %v1596_v28 = vstv %s1595_s18 }
0x110d   :  { %v3180_v45 = vsub.f32 %v1573_v38, %v1596_v28  ;;  %v3182_v48 = vsub.f32 %v1575_v26, %v1596_v28 }
0x110f   :  { %v1599_v56 = vmul.f32 %v3180_v45, %v3180_v45  ;;  %v1600_v20 = vmul.f32 %v3182_v48, %v3182_v48 }
0x1111   :  { %v1601_v51 = vadd.f32 %v1600_v20, %v1599_v56 }
0x1113   :  { %1602 = vadd.xlane.f32.xlu0 %v1601_v51 }
0x1172   :  { %v1558_v61 = vpop.f32.mrf.mxu3 }
0x1173   :  { %v1559_v18 = vadd.f32 %v1558_v61, %v1507_v5 }
0x1175   :  { %v1570_v63 = vmul.f32 %v1568_v16, %v1559_v18  ;;  %vm1565_vm8 = vcmp.ge.f32.partialorder %v1559_v18, 0.0 }
0x1177   :  { %v1574_v6 = vsel %vm1565_vm8, %v1559_v18, %v1570_v63 }
0x117a   :  { %v1561_v14 = vpop.f32.mrf.mxu3 }
0x117b   :  { %v1562_v22 = vadd.f32 %v1561_v14, %v1512_v30 }
0x117d   :  { %v1572_v0 = vmul.f32 %v1568_v16, %v1562_v22  ;;  %vm1567_vm9 = vcmp.ge.f32.partialorder %v1562_v22, 0.0 }
0x117f   :  { %v1576_v34 = vsel %vm1567_vm9, %v1562_v22, %v1572_v0 }
0x1180   :  { %v1657_v8 = vadd.f32 %v1576_v34, %v1574_v6 }
0x1182   :  { %1658 = vadd.xlane.f32.xlu2 %v1657_v8 }
0x1186   :  { %v1603_v9 = vpop.xlane.xlu0 %1602 }
0x1187   :  { %v1604_v58 = vrot.slane %v1603_v9, 4 }
0x1189   :  { %v1605_v17 = vadd.f32 %v1604_v58, %v1603_v9 }
0x118b   :  { %v1606_v60 = vrot.slane %v1605_v17, 2 }
0x118d   :  { %v1607_v19 = vadd.f32 %v1606_v60, %v1605_v17 }
0x118f   :  { %v1608_v40 = vrot.slane %v1607_v19, 1 }
0x1191   :  { %v1609_v11 = vadd.f32 %v1608_v40, %v1607_v19 }
0x1193   :  { %2233 = vpush %v1609_v11 }
0x11c4   :  { %s2234_s19 = spop %2233 }
0x11c5   :  { %s1619_s21 = smul.f32 %s2234_s19, %s3021_s20 }
0x11c7   :  { %v1620_v25 = vstv %s1619_s21 }
0x11c8   :  { %2370 = vrsqrt.f32 %v1620_v25  ;;  %vm1627_vm11 = vweird.f32 %v1620_v25 }
0x11ce   :  { %v2371_v5 = vpop.eup %2370 }
0x11cf   :  { %v1622_v3 = vmul.f32 %v2371_v5, %v1620_v25  ;;  %vm1628_vm0 = vweird.f32 %v2371_v5 }
0x11d0   :  { %vm1629_vm12 = vmor %vm1627_vm11, %vm1628_vm0 }
0x11d1   :  { %v1623_v16 = vmul.f32 %v2371_v5, %v1622_v3 }
0x11d3   :  { %v1624_v30 = vmul.f32 0.5, %v1623_v16 }
0x11d5   :  { %v1625_v32 = vsub.f32 1.5, %v1624_v30 }
0x11d7   :  { %v1626_v33 = vmul.f32 %v2371_v5, %v1625_v32 }
0x11d9   :  { %v1630_v10 = vsel %vm1629_vm12, %v2371_v5, %v1626_v33 }
0x11da   :  { %2235 = vpush %v1630_v10 }
0x11f5   :  { %v1659_v12 = vpop.xlane.xlu2 %1658 }
0x11f6   :  { %v1660_v38 = vrot.slane %v1659_v12, 4 }
0x11f8   :  { %v1661_v27 = vadd.f32 %v1660_v38, %v1659_v12 }
0x11fa   :  { %v1662_v24 = vrot.slane %v1661_v27, 2 }
0x11fc   :  { %v1663_v26 = vadd.f32 %v1662_v24, %v1661_v27 }
0x11fe   :  { %v1664_v41 = vrot.slane %v1663_v26, 1 }
0x1200   :  { %v1665_v2 = vadd.f32 %v1664_v41, %v1663_v26 }
0x1202   :  { %2237 = vpush %v1665_v2 }
0x120b   :  { %s2236_s22 = spop %2235 }
0x120c   :  { %v1632_v29 = vstv %s2236_s22 }
0x120d   :  { %v1633_v47 = vmul.f32 %v1632_v29, %v3136_v62  ;;  %v1634_v57 = vmul.f32 %v1632_v29, %v3138_v13 }
0x120f   :  { %1637 = vperm.xlu2 %2335, %v1633_v47  }
0x1233   :  { %s2238_s23 = spop %2237 }
0x1234   :  { %s1675_s24 = smul.f32 %s2238_s23, %s3007_s4 }
0x1236   :  { %v1676_v54 = vstv %s1675_s24 }
0x1237   :  { %v1677_v44 = vsub.f32 %v1574_v6, %v1676_v54  ;;  %v1678_v15 = vsub.f32 %v1576_v34, %v1676_v54 }
0x1239   :  { %v1679_v55 = vmul.f32 %v1677_v44, %v1677_v44  ;;  %v1680_v36 = vmul.f32 %v1678_v15, %v1678_v15 }
0x123b   :  { %v1681_v50 = vadd.f32 %v1680_v36, %v1679_v55 }
0x123d   :  { %1682 = vadd.xlane.f32.xlu1 %v1681_v50 }
0x1256   :  { %1642 = vperm.xlu1 %2333, %v1634_v57  }
0x125e   :  { %2336 = vset.pattern.permute.xlu1 %v2553_v21 }
0x125f   :  { %1652 = vperm.xlu1 %2336, %v3138_v13  }
0x1267   :  { %1648 = vperm.xlu1 %2336, %v3136_v62  }
0x1269   :  { %v1638_v58 = vpop.permute.xlu2 %1637 }
0x126a   :  { %v1645_v60 = vmul.f32 %v1638_v58, %v3180_v45 }
0x126f   :  { %2337 = vset.pattern.permute.xlu1 %v2557_v37 }
0x12b0   :  { %v1683_v53 = vpop.xlane.xlu1 %1682 }
0x12b1   :  { %v1684_v49 = vrot.slane %v1683_v53, 4 }
0x12b3   :  { %v1685_v7 = vadd.f32 %v1684_v49, %v1683_v53 }
0x12b5   :  { %v1686_v43 = vrot.slane %v1685_v7, 2 }
0x12b7   :  { %v1687_v42 = vadd.f32 %v1686_v43, %v1685_v7 }
0x12b9   :  { %v1688_v28 = vrot.slane %v1687_v42, 1 }
0x12bb   :  { %v1689_v56 = vadd.f32 %v1688_v28, %v1687_v42 }
0x12bd   :  { %2239 = vpush %v1689_v56 }
0x12c8   :  { %v1643_v0 = vpop.permute.xlu1 %1642 }
0x12c9   :  { %v1646_v19 = vmul.f32 %v1643_v0, %v3182_v48 }
0x12d1   :  { %v1653_v6 = vpop.permute.xlu1 %1652 }
0x12d2   :  { %v1656_v40 = vadd.f32 %v1653_v6, %v1646_v19 }
0x12d9   :  { %v1649_v17 = vpop.permute.xlu1 %1648 }
0x12da   :  { %v1655_v11 = vadd.f32 %v1649_v17, %v1645_v60 }
0x12ee   :  { %s2240_s25 = spop %2239 }
0x12ef   :  { %s1699_s28 = smul.f32 %s2240_s25, %s3021_s20 }
0x12f1   :  { %v1700_v20 = vstv %s1699_s28 }
0x12f2   :  { %2372 = vrsqrt.f32 %v1700_v20  ;;  %vm1707_vm14 = vweird.f32 %v1700_v20 }
0x12f8   :  { %v2373_v51 = vpop.eup %2372 }
0x12f9   :  { %v1702_v21 = vmul.f32 %v2373_v51, %v1700_v20  ;;  %vm1708_vm13 = vweird.f32 %v2373_v51 }
0x12fa   :  { %vm1709_vm15 = vmor %vm1707_vm14, %vm1708_vm13 }
0x12fb   :  { %v1703_v61 = vmul.f32 %v2373_v51, %v1702_v21 }
0x12fd   :  { %v1704_v18 = vmul.f32 0.5, %v1703_v61 }
0x12ff   :  { %v1705_v14 = vsub.f32 1.5, %v1704_v18 }
0x1301   :  { %v1706_v63 = vmul.f32 %v2373_v51, %v1705_v14 }
0x1303   :  { %v1710_v22 = vsel %vm1709_vm15, %v2373_v51, %v1706_v63 }
0x1304   :  { %2241 = vpush %v1710_v22 }
0x1335   :  { %s2242_s29 = spop %2241 }
0x1336   :  { %v1712_v34 = vstv %s2242_s29 }
0x1337   :  { %v1713_v8 = vmul.f32 %v1712_v34, %v3136_v62  ;;  %v1714_v9 = vmul.f32 %v1712_v34, %v3138_v13 }
0x1339   :  { %1722 = vperm.xlu0 %2334, %v1714_v9   ;;  %1717 = vperm.xlu2 %2335, %v1713_v8  }
0x1341   :  { %1754 = vrot.lane.b32.xlu2 %v1656_v40, %s2562_s30  ;;  %1752 = vrot.lane.b32.xlu0 %v1655_v11, %s2562_s30 }
0x1342   :  { %2338 = vset.pattern.permute.xlu0 %v2557_v37  ;;  %2342 = vset.pattern.permute.xlu2 %v2559_v31 }
0x1393   :  { %v1718_v25 = vpop.permute.xlu2 %1717 }
0x1394   :  { %v1725_v5 = vmul.f32 %v1718_v25, %v1677_v44 }
0x1396   :  { %v1727_v3 = vadd.f32 %v1725_v5, %v1649_v17 }
0x1398   :  { %1756 = vrot.lane.b32.xlu2 %v1727_v3, %s2562_s30 }
0x139b   :  { %v1755_v37 = vpop.permute.xlu2 %1754 }
0x13a0   :  { %1729 = vrot.lane.b32.xlu2 %v1655_v11, %s2563_s2 }
0x13a8   :  { %1785 = vrot.lane.b32.xlu2 %v3138_v13, %s2556_s6 }
0x13ab   :  { %v1723_v45 = vpop.permute.xlu0 %1722 }
0x13ac   :  { %v1726_v48 = vmul.f32 %v1723_v45, %v1678_v15 }
0x13ae   :  { %v1728_v16 = vadd.f32 %v1726_v48, %v1653_v6 }
0x13b0   :  { %1758 = vrot.lane.b32.xlu1 %v1728_v16, %s2562_s30  ;;  %1735 = vrot.lane.b32.xlu0 %v1728_v16, %s2563_s2 }
0x13b3   :  { %v1753_v30 = vpop.permute.xlu0 %1752 }
0x13b8   :  { %1731 = vrot.lane.b32.xlu1 %v1656_v40, %s2563_s2  ;;  %1783 = vrot.lane.b32.xlu0 %v3136_v62, %s2556_s6  ;;  %s2154_s6 = sld [smem:[#allocation2 + $0x5]] }
0x13be   :  { %v1841_v53 = vstv %s2154_s6 }
0x13c0   :  { %1733 = vrot.lane.b32.xlu1 %v1727_v3, %s2563_s2  ;;  %1780 = vperm.xlu0 %2338, %v3138_v13  }
0x13c8   :  { %1776 = vperm.xlu1 %2337, %v3136_v62   ;;  %2340 = vset.pattern.permute.xlu0 %v2559_v31 }
0x13d0   :  { %2339 = vset.pattern.permute.xlu1 %v2559_v31 }
0x13f2   :  { %v1757_v32 = vpop.permute.xlu2 %1756 }
0x13f3   :  { %v1761_v38 = vsel %vm1760_vm2, %v1753_v30, %v1757_v32  ;;  %v1763_v27 = vsel %vm1760_vm2, %v1757_v32, %v1753_v30 }
0x13fa   :  { %v1730_v2 = vpop.permute.xlu2 %1729 }
0x1402   :  { %v1786_v4 = vpop.permute.xlu2 %1785 }
0x1422   :  { %v1759_v33 = vpop.permute.xlu1 %1758  ;;  %v1736_v31 = vpop.permute.xlu0 %1735 }
0x1423   :  { %v1762_v10 = vsel %vm1760_vm2, %v1755_v37, %v1759_v33  ;;  %v1764_v12 = vsel %vm1760_vm2, %v1759_v33, %v1755_v37 }
0x1424   :  { %2159 = vmatpush.msk.msra.mxu0 %vm1760_vm2, %v1762_v10  ;;  %2165 = vmatpush.msk.msra.mxu1 %vm1766_vm1, %v1764_v12 }
0x1426   :  { %2160 = vmatpush.msk.msra.mxu0 %vm1760_vm2, %v1761_v38  ;;  %2166 = vmatpush.msk.msra.mxu1 %vm1766_vm1, %v1763_v27 }
0x1428   :  { %1803 = vmatpush.msra.mxu0 %v1656_v40  ;;  %1826 = vmatpush.msra.mxu1 %v1728_v16 }
0x142a   :  { %v1732_v24 = vpop.permute.xlu1 %1731  ;;  %1804 = vmatpush.msra.mxu0 %v1655_v11  ;;  %1827 = vmatpush.msra.mxu1 %v1727_v3  ;;  %v1784_v47 = vpop.permute.xlu0 %1783 }
0x142b   :  { %v1739_v26 = vsel %vm1737_vm3, %v1732_v24, %v1736_v31  ;;  %v1741_v41 = vsel %vm1737_vm3, %v1736_v31, %v1732_v24 }
0x142c   :  { %2161 = vmatpush.msk.msra.mxu0 %vm1742_vm4, %v1741_v41  ;;  %2167 = vmatpush.msk.msra.mxu1 %vm1743_vm5, %v1739_v26 }
0x1432   :  { %v1734_v29 = vpop.permute.xlu1 %1733  ;;  %v1781_v57 = vpop.permute.xlu0 %1780 }
0x1433   :  { %v1738_v54 = vsel %vm1737_vm3, %v1730_v2, %v1734_v29  ;;  %v1740_v44 = vsel %vm1737_vm3, %v1734_v29, %v1730_v2 }
0x1434   :  { %2162 = vmatpush.msk.msra.mxu0 %vm1742_vm4, %v1740_v44  ;;  %2168 = vmatpush.msk.msra.mxu1 %vm1743_vm5, %v1738_v54 }
0x1435   :  { %2163 = vmatmul.msk.f32.vlgmr.msra.gmra.mxu0 %vm1218_vm10, %v1784_v47  ;;  %2169 = vmatmul.msk.f32.vlgmr.msra.gmra.mxu1 %vm1218_vm10, %v1784_v47 }
0x143a   :  { %v1777_v55 = vpop.permute.xlu1 %1776 }
0x143d   :  { %2164 = vmatmul.msk.f32.gmra.mxu0 %vm1218_vm10, %v1786_v4  ;;  %2170 = vmatmul.msk.f32.gmra.mxu1 %vm1218_vm10, %v1786_v4 }
0x14b2   :  { %v1808_v23 = vpop.f32.mrf.mxu0  ;;  %v1831_v15 = vpop.f32.mrf.mxu1 }
0x14b3   :  { %v1809_v36 = vadd.f32 %v1808_v23, %v1777_v55  ;;  %v1832_v50 = vadd.f32 %v1831_v15, %v1777_v55 }
0x14b5   :  { %v1842_v43 = vmul.f32 %v1841_v53, %v1809_v36  ;;  %v1843_v42 = vmul.f32 %v1841_v53, %v1832_v50  ;;  %vm1838_vm6 = vcmp.ge.f32.partialorder %v1832_v50, 0.0  ;;  %vm1837_vm8 = vcmp.ge.f32.partialorder %v1809_v36, 0.0 }
0x14b7   :  { %v3220_v21 = vsel %vm1838_vm6, %v1832_v50, %v1843_v42  ;;  %v1846_v18 = vsel %vm1837_vm8, %v1809_v36, %v1842_v43 }
0x14ba   :  { %v1811_v49 = vpop.f32.mrf.mxu0  ;;  %v1834_v7 = vpop.f32.mrf.mxu1 }
0x14bb   :  { %v1812_v28 = vadd.f32 %v1811_v49, %v1781_v57  ;;  %v1835_v56 = vadd.f32 %v1834_v7, %v1781_v57 }
0x14bd   :  { %v1844_v20 = vmul.f32 %v1841_v53, %v1812_v28  ;;  %v1845_v51 = vmul.f32 %v1841_v53, %v1835_v56  ;;  %vm1840_vm9 = vcmp.ge.f32.partialorder %v1835_v56, 0.0  ;;  %vm1839_vm10 = vcmp.ge.f32.partialorder %v1812_v28, 0.0 }
0x14bf   :  { %v3222_v61 = vsel %vm1840_vm9, %v1835_v56, %v1845_v51  ;;  %v1848_v14 = vsel %vm1839_vm10, %v1812_v28, %v1844_v20 }
0x14c0   :  { %v1930_v63 = vadd.f32 %v3222_v61, %v3220_v21  ;;  %v1850_v22 = vadd.f32 %v1848_v14, %v1846_v18 }
0x14c2   :  { %1931 = vadd.xlane.f32.xlu0 %v1930_v63  ;;  %1851 = vadd.xlane.f32.xlu2 %v1850_v22 }
0x1535   :  { %v1852_v0 = vpop.xlane.xlu2 %1851  ;;  %v1932_v33 = vpop.xlane.xlu0 %1931 }
0x1536   :  { %v1853_v6 = vrot.slane %v1852_v0, 4  ;;  %v1933_v10 = vrot.slane %v1932_v33, 4 }
0x1538   :  { %v1854_v34 = vadd.f32 %v1853_v6, %v1852_v0  ;;  %v1934_v38 = vadd.f32 %v1933_v10, %v1932_v33 }
0x153a   :  { %v1855_v8 = vrot.slane %v1854_v34, 2  ;;  %v1935_v27 = vrot.slane %v1934_v38, 2 }
0x153c   :  { %v1856_v9 = vadd.f32 %v1855_v8, %v1854_v34  ;;  %v1936_v41 = vadd.f32 %v1935_v27, %v1934_v38 }
0x153e   :  { %v1857_v58 = vrot.slane %v1856_v9, 1  ;;  %v1937_v47 = vrot.slane %v1936_v41, 1 }
0x1540   :  { %v1858_v17 = vadd.f32 %v1857_v58, %v1856_v9  ;;  %v1938_v4 = vadd.f32 %v1937_v47, %v1936_v41 }
0x1542   :  { %2243 = vpush %v1858_v17 }
0x1573   :  { %s2244_s7 = spop %2243 }
0x1574   :  { %s1868_s8 = smul.f32 %s2244_s7, %s3007_s4 }
0x1576   :  { %v1869_v60 = vstv %s1868_s8 }
0x1577   :  { %v3227_v19 = vsub.f32 %v1846_v18, %v1869_v60  ;;  %v1871_v40 = vsub.f32 %v1848_v14, %v1869_v60 }
0x1579   :  { %v1872_v11 = vmul.f32 %v3227_v19, %v3227_v19  ;;  %v1873_v25 = vmul.f32 %v1871_v40, %v1871_v40 }
0x157b   :  { %v1874_v5 = vadd.f32 %v1873_v25, %v1872_v11 }
0x157d   :  { %1875 = vadd.xlane.f32.xlu1 %v1874_v5 }
0x15f0   :  { %v1876_v3 = vpop.xlane.xlu1 %1875 }
0x15f1   :  { %v1877_v45 = vrot.slane %v1876_v3, 4 }
0x15f3   :  { %v1878_v48 = vadd.f32 %v1877_v45, %v1876_v3 }
0x15f5   :  { %v1879_v16 = vrot.slane %v1878_v48, 2 }
0x15f7   :  { %v1880_v37 = vadd.f32 %v1879_v16, %v1878_v48 }
0x15f9   :  { %v1881_v30 = vrot.slane %v1880_v37, 1 }
0x15fb   :  { %v1882_v32 = vadd.f32 %v1881_v30, %v1880_v37 }
0x15fd   :  { %2245 = vpush %v1882_v32 }
0x162e   :  { %s2246_s9 = spop %2245 }
0x162f   :  { %s1892_s0 = smul.f32 %s2246_s9, %s3021_s20 }
0x1631   :  { %v1893_v12 = vstv %s1892_s0 }
0x1632   :  { %2374 = vrsqrt.f32 %v1893_v12  ;;  %vm1900_vm11 = vweird.f32 %v1893_v12 }
0x1638   :  { %v2375_v31 = vpop.eup %2374 }
0x1639   :  { %v1895_v24 = vmul.f32 %v2375_v31, %v1893_v12  ;;  %vm1901_vm0 = vweird.f32 %v2375_v31 }
0x163a   :  { %vm1902_vm12 = vmor %vm1900_vm11, %vm1901_vm0 }
0x163b   :  { %v1896_v26 = vmul.f32 %v2375_v31, %v1895_v24 }
0x163d   :  { %v1897_v2 = vmul.f32 0.5, %v1896_v26 }
0x163f   :  { %v1898_v29 = vsub.f32 1.5, %v1897_v2 }
0x1641   :  { %v1899_v54 = vmul.f32 %v2375_v31, %v1898_v29 }
0x1643   :  { %v1903_v44 = vsel %vm1902_vm12, %v2375_v31, %v1899_v54 }
0x1644   :  { %2247 = vpush %v1903_v44 }
0x1645   :  { %2249 = vpush %v1938_v4 }
0x1675   :  { %s2248_s10 = spop %2247 }
0x1676   :  { %v1905_v23 = vstv %s2248_s10  ;;  %s2250_s11 = spop %2249 }
0x1677   :  { %v1906_v15 = vmul.f32 %v1905_v23, %v3136_v62  ;;  %v1907_v55 = vmul.f32 %v1905_v23, %v3138_v13  ;;  %s1948_s13 = smul.f32 %s2250_s11, %s3007_s4 }
0x1679   :  { %v1949_v36 = vstv %s1948_s13  ;;  %1915 = vperm.xlu1 %2339, %v1907_v55   ;;  %1910 = vperm.xlu0 %2340, %v1906_v15  }
0x167a   :  { %v1950_v50 = vsub.f32 %v3220_v21, %v1949_v36  ;;  %v1951_v57 = vsub.f32 %v3222_v61, %v1949_v36 }
0x167c   :  { %v1952_v53 = vmul.f32 %v1950_v50, %v1950_v50  ;;  %v1953_v49 = vmul.f32 %v1951_v57, %v1951_v57 }
0x167e   :  { %v1954_v7 = vadd.f32 %v1953_v49, %v1952_v53 }
0x1680   :  { %1955 = vadd.xlane.f32.xlu2 %v1954_v7 }
0x1681   :  { %2341 = vset.pattern.permute.xlu1 %v2558_v1  ;;  %2345 = vset.pattern.permute.xlu0 %v2561_v46 }
0x1682   :  { %1925 = vperm.xlu1 %2341, %v3138_v13  }
0x168a   :  { %1921 = vperm.xlu1 %2341, %v3136_v62  }
0x1692   :  { %2012 = vrot.lane.b32.xlu1 %v3138_v13, %s2560_s12 }
0x1693   :  { %2344 = vset.pattern.permute.xlu1 %v2561_v46 }
0x169a   :  { %2007 = vperm.xlu1 %2344, %v3138_v13  }
0x16eb   :  { %v1916_v43 = vpop.permute.xlu1 %1915  ;;  %v1911_v21 = vpop.permute.xlu0 %1910 }
0x16ec   :  { %v1919_v42 = vmul.f32 %v1916_v43, %v1871_v40  ;;  %v1918_v14 = vmul.f32 %v1911_v21, %v3227_v19 }
0x16f3   :  { %v1956_v28 = vpop.xlane.xlu2 %1955 }
0x16f4   :  { %v1957_v56 = vrot.slane %v1956_v28, 4  ;;  %v1926_v20 = vpop.permute.xlu1 %1925 }
0x16f5   :  { %v1929_v1 = vadd.f32 %v1926_v20, %v1919_v42 }
0x16f6   :  { %v1958_v51 = vadd.f32 %v1957_v56, %v1956_v28 }
0x16f7   :  { %2032 = vmatpush.msrb.mxu2 %v1929_v1 }
0x16f8   :  { %v1959_v61 = vrot.slane %v1958_v51, 2 }
0x16fa   :  { %v1960_v18 = vadd.f32 %v1959_v61, %v1958_v51 }
0x16fc   :  { %v1922_v63 = vpop.permute.xlu1 %1921  ;;  %v1961_v22 = vrot.slane %v1960_v18, 1 }
0x16fd   :  { %v1928_v0 = vadd.f32 %v1922_v63, %v1918_v14 }
0x16fe   :  { %v1962_v6 = vadd.f32 %v1961_v22, %v1960_v18 }
0x16ff   :  { %2033 = vmatpush.msrb.mxu2 %v1928_v0 }
0x1700   :  { %2251 = vpush %v1962_v6 }
0x1704   :  { %v2013_v32 = vpop.permute.xlu1 %2012 }
0x170c   :  { %v2008_v31 = vpop.permute.xlu1 %2007 }
0x1731   :  { %s2252_s4 = spop %2251 }
0x1732   :  { %s1972_s1 = smul.f32 %s2252_s4, %s3021_s20  ;;  %s2564_s20 = smov [#allocation12]  }
0x1734   :  { %v1973_v34 = vstv %s1972_s1 }
0x1735   :  { %2376 = vrsqrt.f32 %v1973_v34  ;;  %vm1980_vm14 = vweird.f32 %v1973_v34 }
0x173b   :  { %v2377_v8 = vpop.eup %2376 }
0x173c   :  { %v1975_v9 = vmul.f32 %v2377_v8, %v1973_v34  ;;  %vm1981_vm13 = vweird.f32 %v2377_v8 }
0x173d   :  { %vm1982_vm15 = vmor %vm1980_vm14, %vm1981_vm13 }
0x173e   :  { %v1976_v58 = vmul.f32 %v2377_v8, %v1975_v9 }
0x1740   :  { %v1977_v17 = vmul.f32 0.5, %v1976_v58 }
0x1742   :  { %v1978_v60 = vsub.f32 1.5, %v1977_v17 }
0x1744   :  { %v1979_v40 = vmul.f32 %v2377_v8, %v1978_v60 }
0x1746   :  { %v1983_v19 = vsel %vm1982_vm15, %v2377_v8, %v1979_v40 }
0x1747   :  { %2253 = vpush %v1983_v19 }
0x1778   :  { %s2254_s14 = spop %2253 }
0x1779   :  { %v1985_v11 = vstv %s2254_s14 }
0x177a   :  { %v1987_v25 = vmul.f32 %v1985_v11, %v3138_v13  ;;  %v1986_v5 = vmul.f32 %v1985_v11, %v3136_v62 }
0x177c   :  { %1995 = vperm.xlu2 %2342, %v1987_v25  }
0x1784   :  { %1990 = vperm.xlu2 %2342, %v1986_v5  }
0x178c   :  { %2010 = vrot.lane.b32.xlu2 %v3136_v62, %s2560_s12  ;;  %s2076_s12 = sshll.u32 %s2564_s20, 4  ;;  %s2077_s12 = int_to_ptr.vmem [resolvable:$true] %s2076_s12 }
0x178d   :  { %2343 = vset.pattern.permute.xlu2 %v2561_v46 }
0x1794   :  { %2003 = vperm.xlu2 %2343, %v3136_v62  }
0x17d6   :  { %v1996_v3 = vpop.permute.xlu2 %1995 }
0x17d7   :  { %v1999_v45 = vmul.f32 %v1996_v3, %v1951_v57 }
0x17d9   :  { %v2001_v48 = vadd.f32 %v1999_v45, %v1926_v20 }
0x17db   :  { %2055 = vmatpush.msrb.mxu3 %v2001_v48 }
0x17de   :  { %v1991_v16 = vpop.permute.xlu2 %1990 }
0x17df   :  { %v1998_v37 = vmul.f32 %v1991_v16, %v1950_v50 }
0x17e1   :  { %v2000_v30 = vadd.f32 %v1998_v37, %v1922_v63 }
0x17e3   :  { %2056 = vmatpush.msrb.mxu3 %v2000_v30 }
0x17e6   :  { %v2011_v13 = vpop.permute.xlu2 %2010 }
0x17e7   :  { %2171 = vmatmul.msk.f32.vlgmr.msrb.gmra.mxu2 %vm944_vm7, %v2011_v13  ;;  %2173 = vmatmul.msk.f32.vlgmr.msrb.gmra.mxu3 %vm944_vm7, %v2011_v13 }
0x17ee   :  { %v2004_v46 = vpop.permute.xlu2 %2003 }
0x17ef   :  { %2172 = vmatmul.msk.f32.gmra.mxu2 %vm944_vm7, %v2013_v32  ;;  %2174 = vmatmul.msk.f32.gmra.mxu3 %vm944_vm7, %v2013_v32 }
0x186a   :  { %v2035_v62 = vpop.f32.mrf.mxu2  ;;  %v2058_v33 = vpop.f32.mrf.mxu3 }
0x186b   :  { %v2036_v10 = vadd.f32 %v2035_v62, %v2004_v46  ;;  %v2059_v12 = vadd.f32 %v2058_v33, %v2004_v46 }
0x186d   :  { %v2064_v38 = vadd.f32 %v2036_v10, %v3148_v39  ;;  %v2065_v27 = vadd.f32 %v2059_v12, %v3171_v35 }
0x186f   :  { %2068 = vst [vmem:[#allocation12] sm:$0xff] %v2064_v38 }
0x1870   :  { %2069 = vst [vmem:[#allocation12 + $0x8] sm:$0xff] %v2065_v27 }
0x1872   :  { %v2061_v24 = vpop.f32.mrf.mxu3  ;;  %v2038_v26 = vpop.f32.mrf.mxu2 }
0x1873   :  { %v2062_v41 = vadd.f32 %v2061_v24, %v2008_v31  ;;  %v2039_v2 = vadd.f32 %v2038_v26, %v2008_v31 }
0x1875   :  { %v2067_v29 = vadd.f32 %v2062_v41, %v3168_v59  ;;  %v2066_v47 = vadd.f32 %v2039_v2, %v3145_v52 }
0x1877   :  { %2071 = vst [vmem:[#allocation12 + $0x18] sm:$0xff] %v2067_v29 }
0x1878   :  { %2070 = vst [vmem:[#allocation12 + $0x10] sm:$0xff] %v2066_v47 }
0x1879   :  { %2084 = dma.vmem_to_hbm [thread:$0]  %s2077_s12, 512, %s2079_s17, [#allocation4], %s2529_s26, %s2529_s26, %s2530_s27  }
0x187a   :  { %2526 = dma.done.wait [#allocation4], 512  }
0x187b   :  { %2527 = vsyncadd [#allocation4], 4294966784 }
0x187c   :  { %2089 = vsyncpa [#allocation3], 1 }
0x187d   :  { %2090 = vsyncpa [#allocation8], 1 }
0x187e   :  { %2091 = vsyncpa [#allocation11], 1 }
0x187f   :  { %2092 = vsyncpa [#allocation4], 1 }
0x1880   :  { %2093 = vsyncpa [#allocation5], 1 }

</bundles_post_ra>
